<compile_context>
chip_gen: v6e
topology: v6e:2x2x1
jax: 0.10.0
libtpu: 0.0.40
codegen_flags: <defaults>
</compile_context>

<pallas_src>
import jax
import jax.numpy as jnp
from jax import lax
from jax.experimental import pallas as pl
from jax.experimental.pallas import tpu as pltpu


def _residual_kernel(x_ref, w1_ref, w2_ref, o_ref):
    # x_ref : (1, C, H, W)   one batch element, NCHW (H on sublanes, W on lanes)
    # w1_ref: (Co, 9*C)      3x3 conv weights, im2col order k = (dh*3+dw)*C + ci
    # w2_ref: (Co, C)        1x1 conv weights
    # o_ref : (1, Co, H*W)   lane-dense output block
    _, C, H, W = x_ref.shape

    x = x_ref[0].astype(jnp.float32)                       # (C, H, W)

    # Zero-pad H and W by 1 on each side, entirely in VMEM (no HBM pad pass).
    zrow = jnp.zeros((C, 1, W), jnp.float32)
    zcol = jnp.zeros((C, H + 2, 1), jnp.float32)
    xp = jnp.concatenate([zrow, x, zrow], axis=1)          # (C, H+2, W)
    xp = jnp.concatenate([zcol, xp, zcol], axis=2)         # (C, H+2, W+2)

    # im2col patch matrix: (9*C, H*W), tap-major rows matching w1_ref columns.
    taps = []
    for dh in range(3):
        for dw in range(3):
            taps.append(xp[:, dh:dh + H, dw:dw + W].reshape(C, H * W))
    patches = jnp.concatenate(taps, axis=0)                # (9*C, H*W)

    # conv3x3 (single fused MXU matmul, K = 9*C) -> ReLU -> conv1x1.
    h1 = jnp.dot(w1_ref[...], patches,
                 preferred_element_type=jnp.float32)       # (Co, H*W)
    h1 = jnp.maximum(h1, 0.0)
    y = jnp.dot(w2_ref[...], h1,
                preferred_element_type=jnp.float32)        # (Co, H*W)

    # Residual add (requires Cin == Co) and lane-dense store.
    out = x.reshape(C, H * W) + y
    o_ref[0] = out.astype(o_ref.dtype)


def residual_layer_pallas(x_nchw, w1_oihw, w2_oihw):
    """x_nchw: (B, Cin, H, W). Returns (B, Co, H, W) = x + conv1x1(relu(conv3x3(x)))."""
    B, Cin, H, W = x_nchw.shape
    Co = w1_oihw.shape[0]
    assert Cin == Co, "residual add requires in_channels == out_channels"

    # (Co, Cin, 3, 3) -> (Co, 3, 3, Cin) -> (Co, 9*Cin)  (matches in-kernel tap order)
    w1f = jnp.transpose(w1_oihw, (0, 2, 3, 1)).reshape(Co, 9 * Cin)
    # (Co, Cin, 1, 1) -> (Co, Cin)
    w2m = w2_oihw[:, :, 0, 0]

    out_flat = pl.pallas_call(
        _residual_kernel,
        out_shape=jax.ShapeDtypeStruct((B, Co, H * W), x_nchw.dtype),
        grid_spec=pltpu.PrefetchScalarGridSpec(
            num_scalar_prefetch=0,
            grid=(B,),
            in_specs=[
                pl.BlockSpec((1, Cin, H, W), lambda b: (b, 0, 0, 0)),
                pl.BlockSpec((Co, 9 * Cin), lambda b: (0, 0)),
                pl.BlockSpec((Co, Cin), lambda b: (0, 0)),
            ],
            out_specs=pl.BlockSpec((1, Co, H * W), lambda b: (b, 0, 0)),
        ),
        compiler_params=pltpu.CompilerParams(
            dimension_semantics=("parallel",),
            vmem_limit_bytes=32 * 1024 * 1024,   # safe on v5e/v6e/v7x
        ),
    )(x_nchw, w1f, w2m)

    # Metadata-only reshape back to NCHW (row-major: no data movement).
    return out_flat.reshape(B, Co, H, W)


def _reference(x_nchw, w1_oihw, w2_oihw):
    """Plain-JAX reference matching PyTorch Conv2d semantics (cross-correlation)."""
    y = lax.conv_general_dilated(
        x_nchw, w1_oihw, window_strides=(1, 1), padding=((1, 1), (1, 1)),
        dimension_numbers=("NCHW", "OIHW", "NCHW"))
    y = jnp.maximum(y, 0.0)
    y = lax.conv_general_dilated(
        y, w2_oihw, window_strides=(1, 1), padding=((0, 0), (0, 0)),
        dimension_numbers=("NCHW", "OIHW", "NCHW"))
    return x_nchw + y


if __name__ == "__main__":
    B, C, H, W = 2, 4, 16, 16  # in_channels == out_channels == 4

    key = jax.random.PRNGKey(0)
    kx, k1, k2 = jax.random.split(key, 3)

    x = jax.random.normal(kx, (B, C, H, W), dtype=jnp.float32)
    # Deterministic synthetic weights (Conv2d shapes: OIHW)
    w1 = 0.1 * jax.random.normal(k1, (C, C, 3, 3), dtype=jnp.float32)
    w2 = 0.1 * jax.random.normal(k2, (C, C, 1, 1), dtype=jnp.float32)

    out = residual_layer_pallas(x, w1, w2)
    out = jax.block_until_ready(out)

    ref = _reference(x, w1, w2)
    assert out.shape == (B, C, H, W)
    assert jnp.allclose(out, ref, atol=1e-4, rtol=1e-4), "mismatch vs reference"

    print("KERNEL_OK")
</pallas_src>

<mosaic_0001>
module attributes {stable_mosaic.version = 11 : i64} {
  func.func @_residual_kernel(%arg0: i32, %arg1: memref<1x4x16x16xf32, #tpu.memory_space<vmem>>, %arg2: memref<4x36xf32, #tpu.memory_space<vmem>>, %arg3: memref<4x4xf32, #tpu.memory_space<vmem>>, %arg4: memref<1x4x256xf32, #tpu.memory_space<vmem>>) attributes {dimension_semantics = [#tpu.dimension_semantics<parallel>], iteration_bounds = array<i64: 2>, scalar_prefetch = 0 : i64, scratch_operands = 0 : i64, tpu.core_type = #tpu.core_type<tc>, window_params = [{transform_indices = @transform_0, window_bounds = array<i64: 1, 4, 16, 16>}, {pipeline_mode = #tpu.pipeline_mode<synchronous>, transform_indices = @transform_1, window_bounds = array<i64: 4, 36>}, {pipeline_mode = #tpu.pipeline_mode<synchronous>, transform_indices = @transform_2, window_bounds = array<i64: 4, 4>}, {transform_indices = @transform_3, window_bounds = array<i64: 1, 4, 256>}]} {
    %c0 = arith.constant 0 : index
    %c0_0 = arith.constant 0 : index
    %c0_1 = arith.constant 0 : index
    %c0_2 = arith.constant 0 : index
    %0 = vector.load %arg1[%c0, %c0_0, %c0_1, %c0_2] : memref<1x4x16x16xf32, #tpu.memory_space<vmem>>, vector<1x4x16x16xf32>
    %1 = vector.shape_cast %0 : vector<1x4x16x16xf32> to vector<4x16x16xf32>
    %cst = arith.constant 0.000000e+00 : f32
    %2 = vector.broadcast %cst : f32 to vector<4x1x16xf32>
    %cst_3 = arith.constant 0.000000e+00 : f32
    %3 = vector.broadcast %cst_3 : f32 to vector<4x18x1xf32>
    %4 = tpu.concatenate %2, %1, %2 in 1 : vector<4x1x16xf32>, vector<4x16x16xf32>, vector<4x1x16xf32> -> vector<4x18x16xf32>
    %5 = tpu.concatenate %3, %4, %3 in 2 : vector<4x18x1xf32>, vector<4x18x16xf32>, vector<4x18x1xf32> -> vector<4x18x18xf32>
    %6 = vector.extract_strided_slice %5 {offsets = [0, 0, 0], sizes = [4, 16, 16], strides = [1, 1, 1]} : vector<4x18x18xf32> to vector<4x16x16xf32>
    %7 = vector.shape_cast %6 : vector<4x16x16xf32> to vector<4x256xf32>
    %8 = vector.extract_strided_slice %5 {offsets = [0, 0, 1], sizes = [4, 16, 16], strides = [1, 1, 1]} : vector<4x18x18xf32> to vector<4x16x16xf32>
    %9 = vector.shape_cast %8 : vector<4x16x16xf32> to vector<4x256xf32>
    %10 = vector.extract_strided_slice %5 {offsets = [0, 0, 2], sizes = [4, 16, 16], strides = [1, 1, 1]} : vector<4x18x18xf32> to vector<4x16x16xf32>
    %11 = vector.shape_cast %10 : vector<4x16x16xf32> to vector<4x256xf32>
    %12 = vector.extract_strided_slice %5 {offsets = [0, 1, 0], sizes = [4, 16, 16], strides = [1, 1, 1]} : vector<4x18x18xf32> to vector<4x16x16xf32>
    %13 = vector.shape_cast %12 : vector<4x16x16xf32> to vector<4x256xf32>
    %14 = vector.extract_strided_slice %5 {offsets = [0, 1, 1], sizes = [4, 16, 16], strides = [1, 1, 1]} : vector<4x18x18xf32> to vector<4x16x16xf32>
    %15 = vector.shape_cast %14 : vector<4x16x16xf32> to vector<4x256xf32>
    %16 = vector.extract_strided_slice %5 {offsets = [0, 1, 2], sizes = [4, 16, 16], strides = [1, 1, 1]} : vector<4x18x18xf32> to vector<4x16x16xf32>
    %17 = vector.shape_cast %16 : vector<4x16x16xf32> to vector<4x256xf32>
    %18 = vector.extract_strided_slice %5 {offsets = [0, 2, 0], sizes = [4, 16, 16], strides = [1, 1, 1]} : vector<4x18x18xf32> to vector<4x16x16xf32>
    %19 = vector.shape_cast %18 : vector<4x16x16xf32> to vector<4x256xf32>
    %20 = vector.extract_strided_slice %5 {offsets = [0, 2, 1], sizes = [4, 16, 16], strides = [1, 1, 1]} : vector<4x18x18xf32> to vector<4x16x16xf32>
    %21 = vector.shape_cast %20 : vector<4x16x16xf32> to vector<4x256xf32>
    %22 = vector.extract_strided_slice %5 {offsets = [0, 2, 2], sizes = [4, 16, 16], strides = [1, 1, 1]} : vector<4x18x18xf32> to vector<4x16x16xf32>
    %23 = vector.shape_cast %22 : vector<4x16x16xf32> to vector<4x256xf32>
    %24 = tpu.concatenate %7, %9, %11, %13, %15, %17, %19, %21, %23 in 0 : vector<4x256xf32>, vector<4x256xf32>, vector<4x256xf32>, vector<4x256xf32>, vector<4x256xf32>, vector<4x256xf32>, vector<4x256xf32>, vector<4x256xf32>, vector<4x256xf32> -> vector<36x256xf32>
    %c0_4 = arith.constant 0 : index
    %c0_5 = arith.constant 0 : index
    %25 = vector.load %arg2[%c0_4, %c0_5] : memref<4x36xf32, #tpu.memory_space<vmem>>, vector<4x36xf32>
    %cst_6 = arith.constant dense<0.000000e+00> : vector<4x256xf32>
    %26 = tpu.matmul %25, %24, %cst_6 {dimension_numbers = #tpu.dot_dimension_numbers<[1], [0], [0], [1], [0, 0, 1, 1], [], []>} : vector<4x36xf32>, vector<36x256xf32>, vector<4x256xf32> -> vector<4x256xf32>
    %cst_7 = arith.constant 0.000000e+00 : f32
    %27 = vector.broadcast %cst_7 : f32 to vector<4x256xf32>
    %28 = arith.maximumf %26, %27 : vector<4x256xf32>
    %c0_8 = arith.constant 0 : index
    %c0_9 = arith.constant 0 : index
    %29 = vector.load %arg3[%c0_8, %c0_9] : memref<4x4xf32, #tpu.memory_space<vmem>>, vector<4x4xf32>
    %cst_10 = arith.constant dense<0.000000e+00> : vector<4x256xf32>
    %30 = tpu.matmul %29, %28, %cst_10 {dimension_numbers = #tpu.dot_dimension_numbers<[1], [0], [0], [1], [0, 0, 1, 1], [], []>} : vector<4x4xf32>, vector<4x256xf32>, vector<4x256xf32> -> vector<4x256xf32>
    %31 = vector.shape_cast %1 : vector<4x16x16xf32> to vector<4x256xf32>
    %32 = arith.addf %31, %30 : vector<4x256xf32>
    %c0_11 = arith.constant 0 : index
    %c0_12 = arith.constant 0 : index
    %c0_13 = arith.constant 0 : index
    %33 = vector.load %arg4[%c0_11, %c0_12, %c0_13] : memref<1x4x256xf32, #tpu.memory_space<vmem>>, vector<1x4x256xf32>
    %34 = vector.shape_cast %33 : vector<1x4x256xf32> to vector<4x256xf32>
    %35 = vector.shape_cast %32 : vector<4x256xf32> to vector<1x4x256xf32>
    tpu.vector_store %arg4[%c0_11, %c0_12, %c0_13], %35 {strides = array<i32>} : memref<1x4x256xf32, #tpu.memory_space<vmem>>, vector<1x4x256xf32>,
    return
  }
  func.func @transform_0(%arg0: i32) -> (i32, i32, i32, i32) {
    %c0_i32 = arith.constant 0 : i32
    %c0_i32_0 = arith.constant 0 : i32
    %c0_i32_1 = arith.constant 0 : i32
    %c0_i32_2 = arith.constant 0 : i32
    return %arg0, %c0_i32, %c0_i32_0, %c0_i32_1 : i32, i32, i32, i32
  }
  func.func @transform_1(%arg0: i32) -> (i32, i32) {
    %c0_i32 = arith.constant 0 : i32
    %c0_i32_0 = arith.constant 0 : i32
    %c0_i32_1 = arith.constant 0 : i32
    return %c0_i32, %c0_i32_0 : i32, i32
  }
  func.func @transform_2(%arg0: i32) -> (i32, i32) {
    %c0_i32 = arith.constant 0 : i32
    %c0_i32_0 = arith.constant 0 : i32
    %c0_i32_1 = arith.constant 0 : i32
    return %c0_i32, %c0_i32_0 : i32, i32
  }
  func.func @transform_3(%arg0: i32) -> (i32, i32, i32) {
    %c0_i32 = arith.constant 0 : i32
    %c0_i32_0 = arith.constant 0 : i32
    %c0_i32_1 = arith.constant 0 : i32
    return %arg0, %c0_i32, %c0_i32_0 : i32, i32, i32
  }
}

</mosaic_0001>

<bundles_post_ra>
// kernel: tpu_custom_call.1
= control target key start
LH: loop header
LB: loop body
LE: loop exit
PB: predicated region body
PF: predicated region fallthrough
CT: control target
= control target key end

     0   :  { %8 = vsyncpa [#allocation3], 0  ;;  %s5119_s0 = inlined_call_operand.hbm [shape: f32[2,4,16,16], index: 0, kind: input, shape index: {}]   ;;  %s5120_s1 = inlined_call_operand.hbm [shape: f32[4,36], index: 1, kind: input, shape index: {}]   ;;  %s5121_s2 = inlined_call_operand.hbm [shape: f32[4,4], index: 2, kind: input, shape index: {}]   ;;  %s5122_s3 = inlined_call_operand.hbm [shape: f32[2,4,256], index: 3, kind: output, shape index: {}]  }
   0x1   :  { %10 = vsyncpa [#allocation3 + $0x1], 0 }
   0x2   :  { %11 = vsyncpa [#allocation6], 0 }
   0x3   :  { %12 = vsyncpa [#allocation4], 0 }
   0x4   :  { %14 = vsyncpa [#allocation4 + $0x1], 0  ;;  %s3217_s12 = smov 0   ;;  %s3219_s13 = smov 0  }
   0x5   :  { %s3221_s14 = smov 0   ;;  %s3223_s15 = smov 0  }
   0x6 LB: > { %s3238_s16 = sadd.s32 4294967295, %s3176_s15   ;;  %s2920_s17 = sadd.s32 4294967294, %s3176_s15   ;;  %s3176_s15 = sphi %s3223_s15, %s5377_s15   ;;  %s3172_s14 = sphi %s3221_s14, %s5376_s14   ;;  %s3168_s13 = sphi %s3219_s13, %s5375_s13   ;;  %s3164_s12 = sphi %s3217_s12, %s5374_s12  }
   0x7   : > { %s3242_s18 = sadd.s32 1, %s3176_s15   ;;  %s27_s19 = sadd.s32 1, %s3172_s14 }
   0x8   : > { %s24_s20 = ssub.s32 %s3176_s15, %s3242_s18  ;;  %p34_p0 = scmp.ne.s32.totalorder %s3172_s14, %s3168_s13 }
   0x9   : > { %p25_p1 = scmp.eq.s32.totalorder %s24_s20, 0  ;;  %p35_p2 = scmp.eq.s32.totalorder %s3176_s15, 0 }
   0xa   : > { %p40_p3 = scmp.ne.s32.totalorder %s3168_s13, %s3164_s12  ;;  %p5123_p4 = scmp.eq.s32.totalorder %s3238_s16, 0 }
   0xb   : > { %s3254_s21 = scalar_select %p25_p1, %s3172_s14, %s27_s19  }
   0xc   : > { %p3256_p5 = por %p35_p2, %p34_p0  ;;  %p3262_p6 = por %p5123_p4, %p40_p3 }
   0xd   : > { %p106_p7 = scmp.eq.s32.totalorder %s3238_s16, 1  ;;  %p112_p8 = scmp.eq.s32.totalorder %s2920_s17, 1 }
   0xe   : > { %s5196_s23 = scalar_select %p3262_p6, 1, 0 }
   0xf   : > { %p2921_p9 = scmp.ge.s32.totalorder %s3176_s15, 1  ;;  %p119_p10 = scmp.lt.s32.totalorder %s3176_s15, 3 }
  0x10   : > { %p3269_p11 = por %p106_p7, %p34_p0  ;;  %p3273_p12 = por %p112_p8, %p40_p3 }
  0x11   : > { %p3277_p13 = pnand %p2921_p9, %p119_p10  ;;  %s3178_s27 = smov [#allocation5]  }
  0x12   : > { %s5197_s24 = scalar_select %p3269_p11, 1, 0 }
  0x13   : > { %s5198_s25 = scalar_select %p3273_p12, 1, 0 }
  0x14   : > { %s5199_s26 = scalar_select %p3277_p13, 1, 0 }
  0x15   : > { %p2958_p2 = pneg %p3277_p13  ;;  %s132_s28 = sshll.u32 %s3178_s27, 4  ;;  %s133_s28 = int_to_ptr.vmem [resolvable:$true] %s132_s28 }
  0x16   : > { %p2975_p4 = scmp.lt.s32.totalorder %s3176_s15, 2  ;;  %p5200_p0 = scmp.eq.s32.totalorder %s3238_s16, 0 }
  0x17   : > { %s3179_s4 = smov [#allocation7]   ;;  %s3039_s6 = scalar_lea.vmem %s133_s28, 64 }
  0x18   : > { %p3287_p7 = pnand %p2958_p2, %p5200_p0  ;;  %p3293_p3 = pnand %p2975_p4, %p3256_p5 }
  0x19   : > { %s143_s5 = sshll.u32 %s3179_s4, 4  ;;  %p3040_p9 = scmp.ne.s32.totalorder %s133_s28, %s3039_s6  ;;  %s144_s5 = int_to_ptr.vmem [resolvable:$true] %s143_s5 }
  0x1a   : > { %p3030_p8 = pneg %p3287_p7  ;;  %p3047_p0 = scmp.lt.s32.totalorder %s133_s28, %s133_s28 }
  0x1b   : > { %p3048_p1 = scmp.lt.s32.totalorder %s3039_s6, %s3039_s6 }
  0x1c   : > { %p3042_p10 = pnand %p3040_p9, %p3030_p8 }
  0x1d   : > { %p3049_p12 = por %p3048_p1, %p3047_p0 }
  0x1e   : > { %p3043_p2 = pneg %p3042_p10 }
  0x20   : > { %p3050_p11 = pnand %p3049_p12, %p3043_p2 }
  0x22   : > { %3053 = shalt.err (!%p3050_p11)
}
  0x23   : > { %2961 = dma.hbm_to_vmem [thread:$0]  (!%p3287_p7), %s5120_s1, 64, %s133_s28, [#allocation6]  }
  0x24   : > { %s154_s9 = sand.u32 1, %s3172_s14   ;;  %s3065_s10 = scalar_lea.vmem %s144_s5, 64 }
  0x25   : > { %p3066_p4 = scmp.ne.s32.totalorder %s144_s5, %s3065_s10  ;;  %p3073_p10 = scmp.lt.s32.totalorder %s144_s5, %s144_s5 }
  0x26   : > { %p3074_p6 = scmp.lt.s32.totalorder %s3065_s10, %s3065_s10 }
  0x27   : > { %p3068_p5 = pnand %p3066_p4, %p3030_p8 }
  0x28   : > { %p3075_p1 = por %p3074_p6, %p3073_p10 }
  0x29   : > { %p3069_p9 = pneg %p3068_p5 }
  0x2b   : > { %p3076_p12 = pnand %p3075_p1, %p3069_p9 }
  0x2d   : > { %3079 = shalt.err (!%p3076_p12)
}
  0x2e   : > { %2964 = dma.hbm_to_vmem [thread:$0]  (!%p3287_p7), %s5121_s2, 64, %s144_s5, [#allocation6]  }
  0x2f   : > { %s2925_s19 = sshll.u32 %s154_s9, 6  ;;  %s2944_s20 = sshll.u32 %s3176_s15, 10 }
  0x30   : > { %s3320_s28 = scalar_lea.hbm %s5119_s0, %s2944_s20  ;;  %s158_s4 = scalar_lea.vmem [#allocation2], %s2925_s19 }
  0x31   : > { %s165_s6 = sshll.u32 %s158_s4, 4  ;;  %s3324_s29 = scalar_lea.sflag [#allocation3], %s154_s9  ;;  %s3322_s6 = int_to_ptr.vmem [resolvable:$true] %s165_s6 }
  0x32   : > { %s3080_s7 = scalar_lea.hbm %s3320_s28, 1024  ;;  %p3082_p11 = pneg %p3293_p3 }
  0x33   : > { %p3081_p6 = scmp.ne.s32.totalorder %s3320_s28, %s3080_s7  ;;  %s3085_s10 = scalar_lea.hbm %s5119_s0, 2048 }
  0x34   : > { %p3086_p2 = scmp.lt.s32.totalorder %s3320_s28, %s5119_s0  ;;  %p3087_p0 = scmp.lt.s32.totalorder %s3085_s10, %s3080_s7 }
  0x35   : > { %p3083_p7 = pnand %p3082_p11, %p3081_p6 }
  0x36   : > { %p3088_p4 = por %p3087_p0, %p3086_p2 }
  0x37   : > { %p3084_p8 = pneg %p3083_p7 }
  0x39   : > { %p3089_p5 = pnand %p3088_p4, %p3084_p8 }
  0x3b   : > { %3092 = shalt.err (!%p3089_p5)
}
  0x3c   : > { %s3093_s9 = scalar_lea.vmem %s3322_s6, 1024  ;;  %s3180_s19 = smov [#allocation2]  }
  0x3d   : > { %p3094_p9 = scmp.ne.s32.totalorder %s3322_s6, %s3093_s9  ;;  %s3098_s20 = sshll.u32 %s3180_s19, 4  ;;  %s3099_s20 = int_to_ptr.vmem [resolvable:$false] %s3098_s20 }
  0x3e   : > { %s3100_s22 = scalar_lea.vmem %s3099_s20, 2048  ;;  %p3101_p12 = scmp.lt.s32.totalorder %s3322_s6, %s3099_s20 }
  0x3f   : > { %p3096_p10 = pnand %p3094_p9, %p3082_p11  ;;  %p3102_p6 = scmp.lt.s32.totalorder %s3100_s22, %s3093_s9 }
  0x41   : > { %p3097_p1 = pneg %p3096_p10  ;;  %p3103_p7 = por %p3102_p6, %p3101_p12 }
  0x43   : > { %p3104_p13 = pnand %p3103_p7, %p3097_p1 }
  0x45   : > { %3107 = shalt.err (!%p3104_p13)
}
  0x46   : > { %s3181_s27 = smov 128   ;;  %s3182_s4 = smov 8  }
  0x47   : > { %2968 = dma.hbm_to_vmem [thread:$0]  (!%p3293_p3), %s3320_s28, 1024, %s3322_s6, %s3324_s29, %s3181_s27, %s3181_s27, %s3182_s4  }
  0x48   : > { %p5203_p11 = scmp.ne.s32.totalorder %s5199_s26, 0 }
  0x4a   : > { %177 = sbr.rel (%p5203_p11) target bundleno = 1137 (0x471), region = 32 }
  0x4f   : > { %s3348_s7 = sand.u32 1, %s3168_s13   ;;  %p5204_p13 = scmp.ne.s32.totalorder %s5196_s23, 0 }
  0x50   : > { %s2929_s5 = sshll.u32 %s3348_s7, 6  ;;  %s180_s8 = scalar_lea.sflag [#allocation3], %s3348_s7 }
  0x51   : > { %s3352_s10 = scalar_lea.vmem [#allocation2], %s2929_s5 }
  0x52   : > { %3151 = dma.done.wait (%p5204_p13), %s180_s8, 1024  }
  0x53   : > { %3153 = vsyncadd (%p5204_p13), %s180_s8, 4294966272  ;;  %p5205_p3 = scmp.eq.s32.totalorder %s3238_s16, 0 }
  0x55   : > { %3155 = dma.done.wait (%p5205_p3), [#allocation6], 128   ;;  %p5206_p8 = pmov %p5205_p3 }
  0x56   : > { %v3363_v0 = vld [vmem:[%s3352_s10 + $0x10] sm:$0xff]  ;;  %v3366_v1 = vld [vmem:[%s3352_s10 + $0x18] sm:$0xff]  ;;  %vm230_vm0 = vcmask 1040384   ;;  %v3369_v2 = vld [vmem:[%s3352_s10] sm:$0xff]  ;;  %s3183_s23 = smov 1   ;;  %v5135_v36 = vmov 0.0  }
  0x57   : > { %3157 = vsyncadd (%p5206_p8), [#allocation6], 4294967168  ;;  %5207 = vst [vmem:[#allocation12_spill] sm:$0xff] %v3363_v0  ;;  %v234_v3 = vrot.slane %v3363_v0, 7  ;;  %v235_v4 = vrot.slane %v3366_v1, 7  ;;  %v3374_v5 = vld [vmem:[%s3352_s10 + $0x8] sm:$0xff]  ;;  %2512 = vmatprep.mubr.f32.mxu0 %v5135_v36  ;;  %2596 = vmatprep.mubr.f32.mxu1 %v5135_v36 }
  0x58   : > { %5208 = vst [vmem:[#allocation13_spill] sm:$0xff] %v3366_v1  ;;  %5209 = vst [vmem:[#allocation14_spill] sm:$0xff] %v3369_v2  ;;  %v231_v6 = vrot.slane %v3369_v2, 7  ;;  %v3378_v7 = vld [vmem:[%s3352_s10 + $0x28] sm:$0xff]  ;;  %v232_v8 = vrot.slane %v3374_v5, 7  ;;  %v3386_v11 = vld [vmem:[%s3352_s10 + $0x20] sm:$0xff] }
  0x59   : > { %5210 = vst [vmem:[#allocation15_spill] sm:$0xff] %v3374_v5  ;;  %5211 = vst [vmem:[#allocation16_spill] sm:$0xff] %v3378_v7  ;;  %v236_v12 = vsel %vm230_vm0, %v234_v3, %v235_v4  ;;  %v256_v15 = vsel %vm230_vm0, %v235_v4, 0.0  ;;  %v238_v16 = vrot.slane %v3378_v7, 7  ;;  %v3399_v18 = vld [vmem:[%s3352_s10 + $0x38] sm:$0xff]  ;;  %v237_v20 = vrot.slane %v3386_v11, 7 }
  0x5a   : > { %5212 = vst [vmem:[#allocation17_spill] sm:$0xff] %v3386_v11  ;;  %275 = vrot.lane.b32.xlu1 %v236_v12, %s3183_s23  ;;  %v233_v14 = vsel %vm230_vm0, %v231_v6, %v232_v8  ;;  %5213 = vst [vmem:[#allocation18_spill] sm:$0xff] %v3399_v18  ;;  %v255_v19 = vsel %vm230_vm0, %v232_v8, 0.0  ;;  %v3408_v23 = vld [vmem:[%s3352_s10 + $0x30] sm:$0xff]  ;;  %v241_v27 = vrot.slane %v3399_v18, 7  ;;  %v252_v32 = vsel %vm230_vm0, 0.0, %v234_v3 }
  0x5b   : > { %269 = vrot.lane.b32.xlu0 %v233_v14, %s3183_s23  ;;  %5214 = vst [vmem:[#allocation19_spill] sm:$0xff] %v3408_v23  ;;  %v257_v26 = vsel %vm230_vm0, %v238_v16, 0.0  ;;  %v239_v28 = vsel %vm230_vm0, %v237_v20, %v238_v16  ;;  %v240_v29 = vrot.slane %v3408_v23, 7  ;;  %v251_v33 = vsel %vm230_vm0, 0.0, %v231_v6  ;;  %s3185_s26 = smov 127   ;;  %s3186_s30 = smov 126  }
  0x5c   : > { %v258_v30 = vsel %vm230_vm0, %v241_v27, 0.0  ;;  %v253_v35 = vsel %vm230_vm0, 0.0, %v237_v20  ;;  %vm303_vm1 = vcmask 7168   ;;  %vm316_vm2 = vcmask 138240   ;;  %s3189_s28 = smov 32   ;;  %s3190_s6 = smov 16  }
  0x5d   : > { %v242_v31 = vsel %vm230_vm0, %v240_v29, %v241_v27  ;;  %v254_v34 = vsel %vm230_vm0, 0.0, %v240_v29  ;;  %vm1709_vm3 = vcmask 1045504   ;;  %v3187_v29 = vmov 1983009808   ;;  %s3191_s29 = smov 64   ;;  %s3192_s11 = smov 48  }
  0x5e   : > { %277 = vrot.lane.b32.xlu1 %v256_v15, %s3183_s23  ;;  %vm1014_vm4 = vcmask 1046528   ;;  %s3193_s17 = smov 80   ;;  %s3194_s9 = smov 96   ;;  %v5256_v2 = vmov 0.0   ;;  %vm521_vm5 = vcmask 130048   ;;  %vm523_vm6 = vcmask 261120  }
  0x5f   : > { %271 = vrot.lane.b32.xlu0 %v255_v19, %s3183_s23  ;;  %s3195_s19 = smov 112   ;;  %vm525_vm7 = vcmask 392192   ;;  %vm527_vm8 = vcmask 523264   ;;  %vm529_vm9 = vcmask 654336   ;;  %vm531_vm10 = vcmask 785408   ;;  %s2932_s20 = sshll.u32 %s3348_s7, 3 }
  0x60   : > { %vm2428_vm11 = vcmask 1043456   ;;  %vm533_vm12 = vcmask 916480   ;;  %vm2438_vm13 = vcmask 293888   ;;  %vm2522_vm14 = vcmask 31744   ;;  %s2945_s22 = sshll.u32 %s3238_s16, 7  ;;  %s213_s27 = scalar_lea.vmem [#allocation8], %s2932_s20 }
  0x61   : > { %s2831_s4 = sshll.u32 %s213_s27, 4  ;;  %s2829_s10 = scalar_lea.hbm %s5122_s3, %s2945_s22  ;;  %s2832_s4 = int_to_ptr.vmem [resolvable:$true] %s2831_s4 }
  0x62   : > { %283 = vrot.lane.b32.xlu1 %v257_v26, %s3183_s23  ;;  %p5371_p0 = scmp.ne.s32.totalorder %s5197_s24, 0 }
  0x63   : > { %281 = vrot.lane.b32.xlu0 %v239_v28, %s3183_s23 }
  0x66   : > { %289 = vrot.lane.b32.xlu1 %v258_v30, %s3183_s23  ;;  %v332_v30 = vunpack.c.l.s4 %v3187_v29 }
  0x67   : > { %287 = vrot.lane.b32.xlu0 %v242_v31, %s3183_s23  ;;  %v334_v31 = vlaneseq }
  0x69   : > { %v3549_v29 = vshrl.u32 %v334_v31, 7 }
  0x6a   : > { %273 = vrot.lane.b32.xlu1 %v252_v32, %s3183_s23 }
  0x6b   : > { %267 = vrot.lane.b32.xlu0 %v251_v33, %s3183_s23 }
  0x6e   : > { %285 = vrot.lane.b32.xlu1 %v254_v34, %s3183_s23 }
  0x6f   : > { %279 = vrot.lane.b32.xlu0 %v253_v35, %s3183_s23  ;;  %s2817_s23 = scalar_lea.sflag [#allocation4], %s3348_s7 }
  0xcc   : > { %v276_v37 = vpop.permute.xlu1 %275 }
  0xcd   : > { %v308_v38 = vsel %vm303_vm1, 0.0, %v276_v37  ;;  %v270_v39 = vpop.permute.xlu0 %269 }
  0xce   : > { %v3438_v40 = vsel %vm316_vm2, %v308_v38, 0.0  ;;  %v305_v41 = vsel %vm303_vm1, 0.0, %v270_v39 }
  0xcf   : > { %v3442_v42 = vsel %vm316_vm2, %v305_v41, 0.0  ;;  %556 = vrot.lane.b32.xlu1 %v3438_v40, %s3185_s26  ;;  %v1716_v33 = vrot.slane %v3438_v40, 2 }
  0xd0   : > { %552 = vrot.lane.b32.xlu0 %v3442_v42, %s3185_s26  ;;  %v278_v43 = vpop.permute.xlu1 %277  ;;  %v1711_v60 = vrot.slane %v3442_v42, 2 }
  0xd1   : > { %v272_v44 = vpop.permute.xlu0 %271  ;;  %v309_v19 = vsel %vm303_vm1, 0.0, %v278_v43 }
  0xd2   : > { %v306_v45 = vsel %vm303_vm1, 0.0, %v272_v44  ;;  %v322_v34 = vsel %vm316_vm2, %v309_v19, 0.0 }
  0xd3   : > { %v3450_v46 = vsel %vm316_vm2, %v306_v45, 0.0 }
  0xd4   : > { %v284_v47 = vpop.permute.xlu1 %283  ;;  %v1713_v52 = vrot.slane %v3450_v46, 2 }
  0xd5   : > { %v312_v48 = vsel %vm303_vm1, 0.0, %v284_v47  ;;  %v282_v49 = vpop.permute.xlu0 %281 }
  0xd6   : > { %v3454_v50 = vsel %vm316_vm2, %v312_v48, 0.0  ;;  %v311_v51 = vsel %vm303_vm1, 0.0, %v282_v49  ;;  %v3479_v4 = vsel %vm1709_vm3, %v1711_v60, %v1713_v52  ;;  %v1718_v52 = vrot.slane %v322_v34, 2 }
  0xd7   : > { %v1723_v53 = vrot.slane %v3454_v50, 2  ;;  %v3460_v54 = vsel %vm316_vm2, %v311_v51, 0.0 }
  0xd8   : > { %v397_v55 = vcombine.low %v3442_v42, %v3460_v54  ;;  %v398_v56 = vcombine.high %v3442_v42, %v3460_v54  ;;  %560 = vrot.lane.b32.xlu0 %v3460_v54, %s3185_s26  ;;  %v290_v57 = vpop.permute.xlu1 %289  ;;  %v1721_v58 = vrot.slane %v3460_v54, 2 }
  0xd9   : > { %v288_v59 = vpop.permute.xlu0 %287  ;;  %v315_v63 = vsel %vm303_vm1, 0.0, %v290_v57 }
  0xda   : > { %v314_v61 = vsel %vm303_vm1, 0.0, %v288_v59  ;;  %v3472_v62 = vsel %vm1709_vm3, %v1721_v58, %v1723_v53  ;;  %v328_v20 = vsel %vm316_vm2, %v315_v63, 0.0 }
  0xdb   : > { %v3476_v3 = vsel %vm316_vm2, %v314_v61, 0.0  ;;  %v1807_v14 = vcombine.high %v3479_v4, %v3472_v62  ;;  %v1728_v35 = vrot.slane %v328_v20, 2 }
  0xdc   : > { %v413_v6 = vcombine.low %v3438_v40, %v3476_v3  ;;  %v414_v8 = vcombine.high %v3438_v40, %v3476_v3  ;;  %782 = vrot.lane.b32.xlu0 %v3442_v42, %s3186_s30  ;;  %564 = vrot.lane.b32.xlu1 %v3476_v3, %s3185_s26  ;;  %v274_v12 = vpop.permute.xlu1 %273  ;;  %v1726_v44 = vrot.slane %v3476_v3, 2  ;;  %v1031_v31 = vrot.slane %v3476_v3, 1 }
  0xdd   : > { %v307_v15 = vsel %vm303_vm1, 0.0, %v274_v12  ;;  %v268_v16 = vpop.permute.xlu0 %267 }
  0xde   : > { %v3495_v26 = vsel %vm316_vm2, %v307_v15, 0.0  ;;  %v304_v27 = vsel %vm303_vm1, 0.0, %v268_v16  ;;  %v3539_v12 = vsel %vm1709_vm3, %v1726_v44, %v1728_v35 }
  0xdf   : > { %v3499_v28 = vsel %vm316_vm2, %v304_v27, 0.0  ;;  %v1715_v39 = vrot.slane %v3495_v26, 2  ;;  %v333_v27 = vunpack.c.0.s8 %v332_v30  ;;  %v1033_v30 = vrot.slane %v328_v20, 1 }
  0xe0   : > { %790 = vrot.lane.b32.xlu0 %v3460_v54, %s3186_s30  ;;  %786 = vrot.lane.b32.xlu1 %v3438_v40, %s3186_s30  ;;  %v286_v32 = vpop.permute.xlu1 %285  ;;  %v1710_v45 = vrot.slane %v3499_v28, 2  ;;  %v1020_v9 = vrot.slane %v3495_v26, 1 }
  0xe1   : > { %v313_v37 = vsel %vm303_vm1, 0.0, %v286_v32  ;;  %v280_v38 = vpop.permute.xlu0 %279  ;;  %v3533_v61 = vsel %vm1709_vm3, %v1715_v39, %v1716_v33  ;;  %v3563_v35 = vsub.s32 %v333_v27, %v3549_v29  ;;  %v1021_v39 = vrot.slane %v3438_v40, 1 }
  0xe2   : > { %v3510_v41 = vsel %vm316_vm2, %v313_v37, 0.0  ;;  %v310_v43 = vsel %vm303_vm1, 0.0, %v280_v38  ;;  %v3542_v15 = vsel %vm1709_vm3, %v1710_v45, %v1711_v60  ;;  %v3558_v60 = vsel %vm1709_vm3, %v1716_v33, %v1718_v52 }
  0xe3   : > { %v345_v47 = vcombine.low %v3495_v26, %v3510_v41  ;;  %v346_v48 = vcombine.high %v3495_v26, %v3510_v41  ;;  %v3520_v49 = vsel %vm316_vm2, %v310_v43, 0.0  ;;  %v1725_v51 = vrot.slane %v3510_v41, 2  ;;  %5215 = vst [vmem:[#allocation20_spill] sm:$0xff] %v3563_v35 }
  0xe4   : > { %v329_v53 = vcombine.low %v3499_v28, %v3520_v49  ;;  %v330_v57 = vcombine.high %v3499_v28, %v3520_v49  ;;  %794 = vrot.lane.b32.xlu1 %v3476_v3, %s3186_s30  ;;  %550 = vrot.lane.b32.xlu0 %v3499_v28, %s3185_s26  ;;  %v1720_v59 = vrot.slane %v3520_v49, 2  ;;  %v1028_v37 = vrot.slane %v3454_v50, 1 }
  0xe5   : > { %v3536_v63 = vsel %vm1709_vm3, %v1725_v51, %v1726_v44  ;;  %v1026_v33 = vrot.slane %v3460_v54, 1  ;;  %v1023_v38 = vrot.slane %v322_v34, 1  ;;  %v3574_v43 = vrot.slane %v1807_v14, %v3563_v35 }
  0xe6   : > { %v3545_v16 = vsel %vm1709_vm3, %v1720_v59, %v1721_v58  ;;  %v1755_v19 = vcombine.high %v3533_v61, %v3536_v63  ;;  %v1823_v58 = vcombine.high %v3558_v60, %v3539_v12  ;;  %v1018_v44 = vrot.slane %v3450_v46, 1 }
  0xe7   : > { %v1739_v32 = vcombine.high %v3542_v15, %v3545_v16  ;;  %v3583_v50 = vsel %vm1014_vm4, %v1031_v31, %v1033_v30  ;;  %v1016_v14 = vrot.slane %v3442_v42, 1  ;;  %v3595_v46 = vsel %vm1014_vm4, %v1026_v33, %v1028_v37 }
  0xe8   : > { %554 = vrot.lane.b32.xlu1 %v3495_v26, %s3185_s26  ;;  %558 = vrot.lane.b32.xlu0 %v3520_v49, %s3185_s26  ;;  %v3577_v20 = vrot.slane %v1823_v58, %v3563_v35  ;;  %v3600_v34 = vsel %vm1014_vm4, %v1021_v39, %v1023_v38  ;;  %v3611_v27 = vrot.slane %v1755_v19, %v3563_v35  ;;  %v3188_v3 = vmov 1934713408  }
  0xe9   : > { %v3603_v51 = vrot.slane %v1739_v32, %v3563_v35  ;;  %v3606_v52 = vsel %vm1014_vm4, %v1016_v14, %v1018_v44  ;;  %v1128_v59 = vcombine.high %v3600_v34, %v3583_v50  ;;  %v3627_v19 = vrot.slane %v397_v55, %v3563_v35 }
  0xea   : > { %v1854_v45 = vcombine.low %v3574_v43, %v3577_v20  ;;  %5217 = vst [vmem:[#allocation22_spill] sm:$0xff] %v3611_v27  ;;  %v1112_v58 = vcombine.high %v3606_v52, %v3595_v46  ;;  %v1855_v30 = vcombine.high %v3574_v43, %v3577_v20  ;;  %v3633_v37 = vrot.slane %v413_v6, %v3563_v35 }
  0xeb   : > { %5216 = vst [vmem:[#allocation21_spill] sm:$0xff] %v3603_v51  ;;  %v1786_v32 = vcombine.low %v3603_v51, %v3611_v27  ;;  %5218 = vst [vmem:[#allocation23_spill] sm:$0xff] %v3627_v19  ;;  %v3636_v38 = vrot.slane %v329_v53, %v3563_v35  ;;  %v3639_v44 = vrot.slane %v1128_v59, %v3563_v35 }
  0xec   : > { %562 = vrot.lane.b32.xlu1 %v3510_v41, %s3185_s26  ;;  %780 = vrot.lane.b32.xlu0 %v3499_v28, %s3186_s30  ;;  %5219 = vst [vmem:[#allocation24_spill] sm:$0xff] %v3633_v37  ;;  %v429_v25 = vcombine.low %v3627_v19, %v3633_v37  ;;  %v3644_v17 = vrot.slane %v345_v47, %v3563_v35 }
  0xed   : > { %5220 = vst [vmem:[#allocation25_spill] sm:$0xff] %v3636_v38  ;;  %5221 = vst [vmem:[#allocation26_spill] sm:$0xff] %v3639_v44  ;;  %v3655_v6 = vrot.slane %v1112_v58, %v3563_v35  ;;  %v3671_v58 = vrot.slane %v398_v56, %v3563_v35  ;;  %v3677_v10 = vrot.slane %v414_v8, %v3563_v35  ;;  %v1025_v8 = vrot.slane %v3520_v49, 1 }
  0xee   : > { %5222 = vst [vmem:[#allocation27_spill] sm:$0xff] %v3644_v17  ;;  %v3683_v24 = vrot.slane %v330_v57, %v3563_v35  ;;  %v3689_v21 = vrot.slane %v346_v48, %v3563_v35  ;;  %v1015_v48 = vrot.slane %v3499_v28, 1  ;;  %v3740_v28 = vsel %vm1014_vm4, %v1020_v9, %v1021_v39 }
  0xef   : > { %5223 = vst [vmem:[#allocation28_spill] sm:$0xff] %v3655_v6  ;;  %5224 = vst [vmem:[#allocation29_spill] sm:$0xff] %v3671_v58  ;;  %v1738_v9 = vcombine.low %v3542_v15, %v3545_v16  ;;  %v1754_v54 = vcombine.low %v3533_v61, %v3536_v63 }
  0xf0   : > { %784 = vrot.lane.b32.xlu1 %v3495_v26, %s3186_s30  ;;  %788 = vrot.lane.b32.xlu0 %v3520_v49, %s3186_s30  ;;  %5225 = vst [vmem:[#allocation30_spill] sm:$0xff] %v3677_v10  ;;  %5226 = vst [vmem:[#allocation31_spill] sm:$0xff] %v3683_v24  ;;  %v3729_v13 = vsel %vm1014_vm4, %v1015_v48, %v1016_v14  ;;  %v3745_v14 = vsel %vm1014_vm4, %v1025_v8, %v1026_v33  ;;  %v1030_v26 = vrot.slane %v3510_v41, 1 }
  0xf1   : > { %5227 = vst [vmem:[#allocation32_spill] sm:$0xff] %v3689_v21  ;;  %v1822_v49 = vcombine.low %v3558_v60, %v3539_v12 }
  0xf2   : > { %v3755_v40 = vsel %vm1014_vm4, %v1030_v26, %v1031_v31  ;;  %v1043_v31 = vcombine.low %v3729_v13, %v3745_v14 }
  0xf3   : > { %v1830_v39 = vrot.slane %v1822_v49, %v3563_v35 }
  0xf4   : > { %792 = vrot.lane.b32.xlu1 %v3510_v41, %s3186_s30  ;;  %1946 = vrot.lane.b32.xlu0 %v3479_v4, %s3185_s26  ;;  %v364_v41 = vunpack.c.l.s4 %v3188_v3  ;;  %v1051_v8 = vrot.slane %v1043_v31, %v3563_v35 }
  0xf8   : > { %1950 = vrot.lane.b32.xlu1 %v3558_v60, %s3185_s26  ;;  %1954 = vrot.lane.b32.xlu0 %v3472_v62, %s3185_s26 }
  0xfc   : > { %1958 = vrot.lane.b32.xlu1 %v3539_v12, %s3185_s26  ;;  %1944 = vrot.lane.b32.xlu0 %v3542_v15, %s3185_s26 }
 0x100   : > { %1948 = vrot.lane.b32.xlu1 %v3533_v61, %s3185_s26  ;;  %1952 = vrot.lane.b32.xlu0 %v3545_v16, %s3185_s26 }
 0x104   : > { %1956 = vrot.lane.b32.xlu1 %v3536_v63, %s3185_s26  ;;  %2176 = vrot.lane.b32.xlu0 %v3479_v4, %s3186_s30 }
 0x108   : > { %2180 = vrot.lane.b32.xlu1 %v3558_v60, %s3186_s30  ;;  %2184 = vrot.lane.b32.xlu0 %v3472_v62, %s3186_s30  ;;  %v1127_v60 = vcombine.low %v3600_v34, %v3583_v50 }
 0x10c   : > { %2188 = vrot.lane.b32.xlu1 %v3539_v12, %s3186_s30  ;;  %1481 = vrot.lane.b32.xlu0 %v3606_v52, %s3186_s30  ;;  %v365_v12 = vunpack.c.0.s8 %v364_v41 }
 0x110   : > { %1485 = vrot.lane.b32.xlu1 %v3600_v34, %s3186_s30  ;;  %1489 = vrot.lane.b32.xlu0 %v3595_v46, %s3186_s30 }
 0x114   : > { %1493 = vrot.lane.b32.xlu1 %v3583_v50, %s3186_s30  ;;  %2174 = vrot.lane.b32.xlu0 %v3542_v15, %s3186_s30  ;;  %v1059_v15 = vcombine.low %v3740_v28, %v3755_v40 }
 0x116   : > { %v1067_v48 = vrot.slane %v1059_v15, %v3563_v35 }
 0x118   : > { %2178 = vrot.lane.b32.xlu1 %v3533_v61, %s3186_s30  ;;  %2182 = vrot.lane.b32.xlu0 %v3545_v16, %s3186_s30  ;;  %v1746_v16 = vrot.slane %v1738_v9, %v3563_v35  ;;  %v1762_v61 = vrot.slane %v1754_v54, %v3563_v35  ;;  %v1076_v54 = vcombine.high %v1051_v8, %v1067_v48 }
 0x11a   : > { %v1771_v33 = vcombine.high %v1746_v16, %v1762_v61  ;;  %v1770_v3 = vcombine.low %v1746_v16, %v1762_v61 }
 0x11c   : > { %2186 = vrot.lane.b32.xlu1 %v3536_v63, %s3186_s30  ;;  %1479 = vrot.lane.b32.xlu0 %v3729_v13, %s3186_s30  ;;  %v1806_v63 = vcombine.low %v3479_v4, %v3472_v62  ;;  %v1111_v62 = vcombine.low %v3606_v52, %v3595_v46  ;;  %v3795_v4 = vsub.s32 %v365_v12, %v3549_v29 }
 0x11d   : > { %v1075_v12 = vcombine.low %v1051_v8, %v1067_v48 }
 0x11e   : > { %v1785_v26 = vrot.slane %v1771_v33, %v3795_v4  ;;  %v1090_v41 = vrot.slane %v1076_v54, %v3795_v4  ;;  %v3807_v49 = vrot.slane %v1770_v3, %v3795_v4 }
 0x120   : > { %1483 = vrot.lane.b32.xlu1 %v3740_v28, %s3186_s30  ;;  %1487 = vrot.lane.b32.xlu0 %v3745_v14, %s3186_s30  ;;  %5228 = vst [vmem:[#allocation33_spill] sm:$0xff] %v3807_v49  ;;  %v1802_v16 = vcombine.high %v3807_v49, %v5135_v36 }
 0x124   : > { %1491 = vrot.lane.b32.xlu1 %v3755_v40, %s3186_s30  ;;  %1251 = vrot.lane.b32.xlu0 %v3606_v52, %s3185_s26  ;;  %s3196_s30 = smov [#allocation8]  }
 0x128   : > { %1255 = vrot.lane.b32.xlu1 %v3600_v34, %s3185_s26  ;;  %1259 = vrot.lane.b32.xlu0 %v3595_v46, %s3185_s26  ;;  %v1135_v34 = vrot.slane %v1127_v60, %v3563_v35  ;;  %v1119_v46 = vrot.slane %v1111_v62, %v3563_v35  ;;  %v1862_v60 = vrot.slane %v1854_v45, %v3795_v4 }
 0x12a   : > { %v1144_v52 = vcombine.high %v1119_v46, %v1135_v34  ;;  %v1143_v31 = vcombine.low %v1119_v46, %v1135_v34  ;;  %v3829_v34 = vrot.slane %v1075_v12, %v3795_v4  ;;  %v1794_v46 = vrot.slane %v1786_v32, %v3795_v4 }
 0x12c   : > { %1263 = vrot.lane.b32.xlu1 %v3583_v50, %s3185_s26  ;;  %1249 = vrot.lane.b32.xlu0 %v3729_v13, %s3185_s26  ;;  %v1814_v50 = vrot.slane %v1806_v63, %v3563_v35  ;;  %v1158_v15 = vrot.slane %v1144_v52, %v3795_v4  ;;  %v3815_v61 = vrot.slane %v1143_v31, %v3795_v4 }
 0x12d   : > { %5231 = vst [vmem:[#allocation36_spill] sm:$0xff] %v3829_v34  ;;  %v1107_v45 = vcombine.high %v3829_v34, %v5135_v36  ;;  %v1872_v31 = vcombine.high %v1862_v60, %v5135_v36 }
 0x12e   : > { %v1839_v9 = vcombine.high %v1814_v50, %v1830_v39  ;;  %5229 = vst [vmem:[#allocation34_spill] sm:$0xff] %v3815_v61  ;;  %v1838_v63 = vcombine.low %v1814_v50, %v1830_v39  ;;  %v1175_v33 = vcombine.high %v3815_v61, %v5135_v36  ;;  %v1803_v50 = vcombine.high %v1785_v26, %v5135_v36 }
 0x12f   : > { %v1176_v3 = vcombine.high %v1158_v15, %v5135_v36 }
 0x130   : > { %1253 = vrot.lane.b32.xlu1 %v3740_v28, %s3185_s26  ;;  %1257 = vrot.lane.b32.xlu0 %v3745_v14, %s3185_s26  ;;  %v1853_v29 = vrot.slane %v1839_v9, %v3795_v4  ;;  %v3826_v62 = vrot.slane %v1838_v63, %v3795_v4 }
 0x132   : > { %5230 = vst [vmem:[#allocation35_spill] sm:$0xff] %v3826_v62  ;;  %v1870_v39 = vcombine.high %v3826_v62, %v5135_v36  ;;  %v1871_v48 = vcombine.high %v1853_v29, %v5135_v36 }
 0x134   : > { %1261 = vrot.lane.b32.xlu1 %v3755_v40, %s3185_s26  ;;  %1879 = vrot.lane.b32.xlu0 %v1785_v26, %s3189_s28  ;;  %s3108_s26 = scalar_lea.vmem %s2832_s4, 128 }
 0x135   : > { %p3109_p2 = scmp.ne.s32.totalorder %s2832_s4, %s3108_s26 }
 0x137   : > { %p3110_p4 = pnand %p3109_p2, %p5371_p0 }
 0x138   : > { %1907 = vrot.lane.b32.xlu1 %v1853_v29, %s3189_s28  ;;  %1184 = vrot.lane.b32.xlu0 %v1090_v41, %s3189_s28 }
 0x139   : > { %p3111_p5 = pneg %p3110_p4 }
 0x13c   : > { %1212 = vrot.lane.b32.xlu1 %v1158_v15, %s3189_s28  ;;  %1875 = vrot.lane.b32.xlu0 %v1802_v16, %s3190_s6  ;;  %v1108_v15 = vcombine.high %v1090_v41, %v5135_v36  ;;  %v1159_v16 = vcombine.low %v3655_v6, %v3639_v44 }
 0x13e   : > { %v3877_v41 = vrot.slane %v1159_v16, %v3795_v4 }
 0x140   : > { %1915 = vrot.lane.b32.xlu1 %v1862_v60, %s3191_s29  ;;  %1208 = vrot.lane.b32.xlu0 %v1175_v33, %s3190_s6  ;;  %5239 = vst [vmem:[#allocation44_spill] sm:$0xff] %v3877_v41 }
 0x141   : > { %v3845_v9 = vpop.permute.xlu1 %556 }
 0x142   : > { %v3839_v8 = vpop.permute.xlu0 %552  ;;  %5233 = vst [vmem:[#allocation38_spill] sm:$0xff] %v3845_v9 }
 0x143   : > { %5232 = vst [vmem:[#allocation37_spill] sm:$0xff] %v3839_v8 }
 0x144   : > { %1903 = vrot.lane.b32.xlu1 %v1870_v39, %s3190_s6  ;;  %1180 = vrot.lane.b32.xlu0 %v1107_v45, %s3190_s6  ;;  %v1804_v39 = vcombine.high %v1794_v46, %v5135_v36 }
 0x148   : > { %1911 = vrot.lane.b32.xlu1 %v1871_v48, %s3192_s11  ;;  %1883 = vrot.lane.b32.xlu0 %v1803_v50, %s3192_s11 }
 0x14a   : > { %v3847_v54 = vpop.permute.xlu0 %560 }
 0x14b   : > { %5234 = vst [vmem:[#allocation39_spill] sm:$0xff] %v3847_v54  ;;  %v642_v26 = vcombine.low %v3839_v8, %v3847_v54 }
 0x14c   : > { %1216 = vrot.lane.b32.xlu1 %v1176_v3, %s3192_s11  ;;  %1887 = vrot.lane.b32.xlu0 %v1794_v46, %s3191_s29  ;;  %v3900_v46 = vrot.slane %v429_v25, %v3795_v4 }
 0x14d   : > { %v650_v63 = vrot.slane %v642_v26, %v3563_v35  ;;  %v3894_v26 = vrot.slane %v1855_v30, %v3795_v4 }
 0x14e   : > { %v3858_v52 = vpop.permute.xlu1 %564  ;;  %v3860_v29 = vpop.permute.xlu0 %782  ;;  %5244 = vst [vmem:[#allocation49_spill] sm:$0xff] %v3900_v46  ;;  %v461_v30 = vcombine.high %v3900_v46, %v5135_v36 }
 0x14f   : > { %5235 = vst [vmem:[#allocation40_spill] sm:$0xff] %v3858_v52  ;;  %5236 = vst [vmem:[#allocation41_spill] sm:$0xff] %v3860_v29  ;;  %v658_v32 = vcombine.low %v3845_v9, %v3858_v52 }
 0x150   : > { %1919 = vrot.lane.b32.xlu1 %v1872_v31, %s3193_s17  ;;  %1188 = vrot.lane.b32.xlu0 %v1108_v15, %s3192_s11  ;;  %5243 = vst [vmem:[#allocation48_spill] sm:$0xff] %v3894_v26 }
 0x151   : > { %v666_v12 = vrot.slane %v658_v32, %v3563_v35 }
 0x152   : > { %v3872_v33 = vpop.permute.xlu1 %786  ;;  %v3874_v60 = vpop.permute.xlu0 %790 }
 0x153   : > { %5237 = vst [vmem:[#allocation42_spill] sm:$0xff] %v3872_v33  ;;  %5238 = vst [vmem:[#allocation43_spill] sm:$0xff] %v3874_v60  ;;  %v674_v45 = vcombine.low %v650_v63, %v666_v12  ;;  %v872_v16 = vcombine.low %v3860_v29, %v3874_v60  ;;  %v675_v32 = vcombine.high %v650_v63, %v666_v12 }
 0x154   : > { %1220 = vrot.lane.b32.xlu1 %v3877_v41, %s3191_s29  ;;  %1891 = vrot.lane.b32.xlu0 %v1804_v39, %s3193_s17 }
 0x155   : > { %v3884_v48 = vrot.slane %v674_v45, %v3795_v4  ;;  %v880_v39 = vrot.slane %v872_v16, %v3563_v35 }
 0x156   : > { %v3886_v50 = vpop.permute.xlu1 %794  ;;  %v3888_v3 = vpop.permute.xlu0 %550 }
 0x157   : > { %5240 = vst [vmem:[#allocation45_spill] sm:$0xff] %v3884_v48  ;;  %5241 = vst [vmem:[#allocation46_spill] sm:$0xff] %v3886_v50  ;;  %v888_v31 = vcombine.low %v3872_v33, %v3886_v50  ;;  %v706_v15 = vcombine.high %v3884_v48, %v5135_v36 }
 0x158   : > { %5242 = vst [vmem:[#allocation47_spill] sm:$0xff] %v3888_v3  ;;  %1923 = vrot.lane.b32.xlu1 %v3894_v26, %s3194_s9 }
 0x159   : > { %739 = vrot.lane.b32.xlu0 %v706_v15, %s3190_s6  ;;  %v896_v43 = vrot.slane %v888_v31, %v3563_v35  ;;  %v3927_v31 = vrot.slane %v675_v32, %v3795_v4 }
 0x15a   : > { %v3912_v20 = vpop.permute.xlu1 %554  ;;  %v3914_v25 = vpop.permute.xlu0 %558 }
 0x15b   : > { %5245 = vst [vmem:[#allocation50_spill] sm:$0xff] %v3912_v20  ;;  %5246 = vst [vmem:[#allocation51_spill] sm:$0xff] %v3914_v25  ;;  %v574_v45 = vcombine.low %v3888_v3, %v3914_v25  ;;  %v904_v57 = vcombine.low %v880_v39, %v896_v43  ;;  %v905_v42 = vcombine.high %v880_v39, %v896_v43 }
 0x15c   : > { %494 = vrot.lane.b32.xlu1 %v461_v30, %s3190_s6 }
 0x15d   : > { %v3934_v63 = vrot.slane %v574_v45, %v3563_v35  ;;  %v3944_v32 = vrot.slane %v905_v42, %v3795_v4  ;;  %v3947_v43 = vrot.slane %v904_v57, %v3795_v4 }
 0x15e   : > { %v3922_v56 = vpop.permute.xlu1 %562  ;;  %v3924_v15 = vpop.permute.xlu0 %780 }
 0x15f   : > { %5247 = vst [vmem:[#allocation52_spill] sm:$0xff] %v3922_v56  ;;  %5248 = vst [vmem:[#allocation53_spill] sm:$0xff] %v3924_v15  ;;  %v590_v59 = vcombine.low %v3912_v20, %v3922_v56  ;;  %v936_v57 = vcombine.high %v3947_v43, %v5135_v36 }
 0x160   : > { %743 = vrot.lane.b32.xlu1 %v3927_v31, %s3189_s28  ;;  %5251 = vst [vmem:[#allocation56_spill] sm:$0xff] %v3947_v43 }
 0x161   : > { %v3937_v12 = vrot.slane %v590_v59, %v3563_v35 }
 0x162   : > { %v3939_v16 = vpop.permute.xlu1 %784  ;;  %v3941_v30 = vpop.permute.xlu0 %788 }
 0x163   : > { %5249 = vst [vmem:[#allocation54_spill] sm:$0xff] %v3939_v16  ;;  %5250 = vst [vmem:[#allocation55_spill] sm:$0xff] %v3941_v30  ;;  %v606_v39 = vcombine.low %v3934_v63, %v3937_v12  ;;  %v804_v59 = vcombine.low %v3924_v15, %v3941_v30 }
 0x164   : > { %973 = vrot.lane.b32.xlu1 %v3944_v32, %s3189_s28 }
 0x165   : > { %v3958_v47 = vrot.slane %v606_v39, %v3795_v4  ;;  %v3972_v45 = vrot.slane %v804_v59, %v3563_v35 }
 0x166   : > { %v3960_v42 = vpop.permute.xlu1 %792  ;;  %v3962_v22 = vpop.permute.xlu0 %1946 }
 0x167   : > { %5252 = vst [vmem:[#allocation57_spill] sm:$0xff] %v3958_v47  ;;  %5253 = vst [vmem:[#allocation58_spill] sm:$0xff] %v3960_v42  ;;  %v820_v55 = vcombine.low %v3939_v16, %v3960_v42  ;;  %v638_v53 = vcombine.high %v3958_v47, %v5135_v36 }
 0x168   : > { %969 = vrot.lane.b32.xlu1 %v936_v57, %s3190_s6 }
 0x169   : > { %v3975_v39 = vrot.slane %v820_v55, %v3563_v35  ;;  %711 = vrot.lane.b32.xlu0 %v638_v53, %s3190_s6 }
 0x16a   : > { %v1951_v23 = vpop.permute.xlu1 %1950  ;;  %v1955_v0 = vpop.permute.xlu0 %1954 }
 0x16b   : > { %5254 = vst [vmem:[#allocation59_spill] sm:$0xff] %v3975_v39  ;;  %v836_v18 = vcombine.low %v3972_v45, %v3975_v39  ;;  %v2036_v36 = vcombine.low %v3962_v22, %v1955_v0  ;;  %v2037_v6 = vcombine.high %v3962_v22, %v1955_v0 }
 0x16d   : > { %v3984_v57 = vrot.slane %v836_v18, %v3795_v4  ;;  %v3991_v7 = vrot.slane %v2036_v36, %v3563_v35  ;;  %v4069_v56 = vrot.slane %v2037_v6, %v3563_v35 }
 0x16e   : > { %v1959_v59 = vpop.permute.xlu1 %1958  ;;  %v3986_v11 = vpop.permute.xlu0 %1944 }
 0x16f   : > { %5255 = vst [vmem:[#allocation60_spill] sm:$0xff] %v3984_v57  ;;  %v2052_v55 = vcombine.low %v1951_v23, %v1959_v59  ;;  %v868_v53 = vcombine.high %v3984_v57, %v5256_v2  ;;  %v2053_v16 = vcombine.high %v1951_v23, %v1959_v59 }
 0x171   : > { %v3994_v5 = vrot.slane %v2052_v55, %v3563_v35  ;;  %941 = vrot.lane.b32.xlu0 %v868_v53, %s3190_s6  ;;  %v4063_v59 = vrot.slane %v2053_v16, %v3563_v35 }
 0x172   : > { %v3997_v1 = vpop.permute.xlu1 %1948  ;;  %v3999_v46 = vpop.permute.xlu0 %1952 }
 0x173   : > { %v2069_v34 = vcombine.high %v3991_v7, %v3994_v5  ;;  %v1968_v43 = vcombine.low %v3986_v11, %v3999_v46  ;;  %v1969_v27 = vcombine.high %v3986_v11, %v3999_v46 }
 0x175   : > { %v4010_v55 = vrot.slane %v2069_v34, %v3795_v4  ;;  %v4017_v18 = vrot.slane %v1968_v43, %v3563_v35 }
 0x176   : > { %v4007_v36 = vpop.permute.xlu1 %1956  ;;  %v2177_v61 = vpop.permute.xlu0 %2176 }
 0x177   : > { %v1984_v53 = vcombine.low %v3997_v1, %v4007_v36  ;;  %2137 = vrot.lane.b32.xlu0 %v4010_v55, %s3189_s28 }
 0x179   : > { %v4020_v49 = vrot.slane %v1984_v53, %v3563_v35 }
 0x17a   : > { %v2181_v48 = vpop.permute.xlu1 %2180  ;;  %v2185_v57 = vpop.permute.xlu0 %2184 }
 0x17b   : > { %v2001_v34 = vcombine.high %v4017_v18, %v4020_v49  ;;  %v2266_v62 = vcombine.low %v2177_v61, %v2185_v57  ;;  %v2267_v37 = vcombine.high %v2177_v61, %v2185_v57 }
 0x17d   : > { %v4029_v10 = vrot.slane %v2001_v34, %v3795_v4  ;;  %v4037_v58 = vrot.slane %v2266_v62, %v3563_v35  ;;  %v4083_v6 = vrot.slane %v2267_v37, %v3563_v35 }
 0x17e   : > { %v2189_v21 = vpop.permute.xlu1 %2188  ;;  %v4026_v24 = vpop.permute.xlu0 %1481 }
 0x17f   : > { %v2282_v43 = vcombine.low %v2181_v48, %v2189_v21  ;;  %2109 = vrot.lane.b32.xlu0 %v4029_v10, %s3189_s28  ;;  %v2283_v3 = vcombine.high %v2181_v48, %v2189_v21  ;;  %v2084_v48 = vcombine.low %v4069_v56, %v4063_v59 }
 0x181   : > { %v4034_v53 = vrot.slane %v2282_v43, %v3563_v35  ;;  %v4074_v22 = vrot.slane %v2283_v3, %v3563_v35 }
 0x182   : > { %v4039_v47 = vpop.permute.xlu1 %1485  ;;  %v4041_v15 = vpop.permute.xlu0 %1489 }
 0x183   : > { %v2299_v30 = vcombine.high %v4037_v58, %v4034_v53  ;;  %v1571_v34 = vcombine.low %v4026_v24, %v4041_v15  ;;  %v2314_v60 = vcombine.low %v4083_v6, %v4074_v22  ;;  %v1572_v17 = vcombine.high %v4026_v24, %v4041_v15 }
 0x185   : > { %v4052_v43 = vrot.slane %v2299_v30, %v3795_v4  ;;  %v4066_v25 = vrot.slane %v1571_v34, %v3563_v35  ;;  %v4105_v54 = vrot.slane %v2314_v60, %v3795_v4 }
 0x186   : > { %v4047_v42 = vpop.permute.xlu1 %1493  ;;  %v4049_v44 = vpop.permute.xlu0 %2174 }
 0x187   : > { %v1587_v62 = vcombine.low %v4039_v47, %v4047_v42  ;;  %2367 = vrot.lane.b32.xlu1 %v4052_v43, %s3189_s28 }
 0x189   : > { %v4060_v23 = vrot.slane %v1587_v62, %v3563_v35 }
 0x18a   : > { %v2179_v30 = vpop.permute.xlu1 %2178  ;;  %v2183_v20 = vpop.permute.xlu0 %2182 }
 0x18b   : > { %v1604_v0 = vcombine.high %v4066_v25, %v4060_v23  ;;  %v2198_v62 = vcombine.low %v4049_v44, %v2183_v20 }
 0x18d   : > { %v4078_v21 = vrot.slane %v1604_v0, %v3795_v4  ;;  %v4091_v3 = vrot.slane %v2198_v62, %v3563_v35  ;;  %v4094_v0 = vrot.slane %v2084_v48, %v3795_v4 }
 0x18e   : > { %v2187_v16 = vpop.permute.xlu1 %2186  ;;  %v1480_v19 = vpop.permute.xlu0 %1479 }
 0x18f   : > { %v2214_v34 = vcombine.low %v2179_v30, %v2187_v16  ;;  %1672 = vrot.lane.b32.xlu1 %v4078_v21, %s3189_s28  ;;  %v2215_v11 = vcombine.high %v2179_v30, %v2187_v16  ;;  %v1588_v30 = vcombine.high %v4039_v47, %v4047_v42 }
 0x191   : > { %v4088_v61 = vrot.slane %v2214_v34, %v3563_v35  ;;  %v1985_v34 = vcombine.high %v3997_v1, %v4007_v36  ;;  %v4141_v16 = vrot.slane %v2215_v11, %v3563_v35  ;;  %v1602_v11 = vrot.slane %v1588_v30, %v3563_v35 }
 0x192   : > { %v1484_v57 = vpop.permute.xlu1 %1483  ;;  %v1488_v29 = vpop.permute.xlu0 %1487 }
 0x193   : > { %2145 = vrot.lane.b32.xlu1 %v4094_v0, %s3191_s29  ;;  %v2231_v37 = vcombine.high %v4091_v3, %v4088_v61  ;;  %v1504_v33 = vcombine.high %v1480_v19, %v1488_v29  ;;  %v1503_v62 = vcombine.low %v1480_v19, %v1488_v29  ;;  %v4117_v1 = vrot.slane %v1985_v34, %v3563_v35 }
 0x195   : > { %v4108_v48 = vrot.slane %v2231_v37, %v3795_v4  ;;  %v4120_v19 = vrot.slane %v1504_v33, %v3563_v35  ;;  %v2199_v33 = vcombine.high %v4049_v44, %v2183_v20 }
 0x196   : > { %v1492_v50 = vpop.permute.xlu1 %1491  ;;  %v1252_v8 = vpop.permute.xlu0 %1251 }
 0x197   : > { %v1519_v51 = vcombine.low %v1484_v57, %v1492_v50  ;;  %v1520_v9 = vcombine.high %v1484_v57, %v1492_v50  ;;  %2375 = vrot.lane.b32.xlu1 %v4105_v54, %s3191_s29  ;;  %2339 = vrot.lane.b32.xlu0 %v4108_v48, %s3189_s28  ;;  %v4129_v50 = vrot.slane %v1503_v62, %v3563_v35 }
 0x198   : > { %v1983_v57 = vrot.slane %v1969_v27, %v3563_v35  ;;  %v2213_v38 = vrot.slane %v2199_v33, %v3563_v35 }
 0x199   : > { %v4123_v29 = vrot.slane %v1519_v51, %v3563_v35  ;;  %v4126_v60 = vrot.slane %v1520_v9, %v3563_v35 }
 0x19a   : > { %v1256_v46 = vpop.permute.xlu1 %1255  ;;  %v1260_v36 = vpop.permute.xlu0 %1259  ;;  %v2016_v9 = vcombine.low %v1983_v57, %v4117_v1 }
 0x19b   : > { %5257 = vst [vmem:[#allocation61_spill] sm:$0xff] %v4126_v60  ;;  %v1536_v51 = vcombine.high %v4129_v50, %v4123_v29  ;;  %v1342_v34 = vcombine.high %v1252_v8, %v1260_v36  ;;  %v1341_v62 = vcombine.low %v1252_v8, %v1260_v36  ;;  %v2246_v36 = vcombine.low %v2213_v38, %v4141_v16 }
 0x19c   : > { %v1551_v39 = vcombine.low %v4120_v19, %v4126_v60 }
 0x19d   : > { %v4146_v37 = vrot.slane %v1536_v51, %v3795_v4  ;;  %v4154_v47 = vrot.slane %v1342_v34, %v3563_v35  ;;  %v1586_v51 = vrot.slane %v1572_v17, %v3563_v35 }
 0x19e   : > { %v1264_v52 = vpop.permute.xlu1 %1263  ;;  %v4143_v27 = vpop.permute.xlu0 %1249 }
 0x19f   : > { %v1357_v44 = vcombine.low %v1256_v46, %v1264_v52  ;;  %v1358_v20 = vcombine.high %v1256_v46, %v1264_v52  ;;  %1644 = vrot.lane.b32.xlu0 %v4146_v37, %s3189_s28  ;;  %v4164_v52 = vrot.slane %v1341_v62, %v3563_v35  ;;  %v4171_v46 = vrot.slane %v2016_v9, %v3795_v4 }
 0x1a0   : > { %v4186_v9 = vrot.slane %v2246_v36, %v3795_v4  ;;  %v2085_v36 = vcombine.high %v4069_v56, %v4063_v59  ;;  %v2017_v59 = vcombine.high %v1983_v57, %v4117_v1  ;;  %v1620_v57 = vcombine.high %v1586_v51, %v1602_v11 }
 0x1a1   : > { %v4157_v8 = vrot.slane %v1357_v44, %v3563_v35  ;;  %v4160_v42 = vrot.slane %v1358_v20, %v3563_v35  ;;  %v1619_v20 = vcombine.low %v1586_v51, %v1602_v11 }
 0x1a2   : > { %v4166_v24 = vpop.permute.xlu1 %1253  ;;  %v4168_v15 = vpop.permute.xlu0 %1257  ;;  %v4220_v56 = vrot.slane %v2085_v36, %v3795_v4  ;;  %v4268_v51 = vrot.slane %v1620_v57, %v3795_v4 }
 0x1a3   : > { %2117 = vrot.lane.b32.xlu0 %v4171_v46, %s3191_s29  ;;  %v1374_v34 = vcombine.high %v4164_v52, %v4157_v8  ;;  %v1273_v30 = vcombine.low %v4143_v27, %v4168_v15 }
 0x1a5   : > { %v4189_v44 = vrot.slane %v1374_v34, %v3795_v4  ;;  %v4198_v33 = vrot.slane %v1273_v30, %v3563_v35  ;;  %v4206_v34 = vrot.slane %v1619_v20, %v3795_v4  ;;  %v4228_v20 = vrot.slane %v1551_v39, %v3795_v4 }
 0x1a6   : > { %v4183_v62 = vpop.permute.xlu1 %1261  ;;  %v5258_v39 = vcombine.low %v3991_v7, %v3994_v5  ;;  %v2247_v7 = vcombine.high %v2213_v38, %v4141_v16  ;;  %v2298_v38 = vcombine.low %v4037_v58, %v4034_v53 }
 0x1a7   : > { %v1289_v17 = vcombine.low %v4166_v24, %v4183_v62  ;;  %2347 = vrot.lane.b32.xlu0 %v4186_v9, %s3191_s29  ;;  %1442 = vrot.lane.b32.xlu1 %v4189_v44, %s3189_s28 }
 0x1a8   : > { %v4248_v1 = vrot.slane %v5258_v39, %v3795_v4  ;;  %v4283_v16 = vrot.slane %v2247_v7, %v3795_v4  ;;  %v2101_v7 = vcombine.high %v4010_v55, %v5256_v2 }
 0x1a9   : > { %v4201_v26 = vrot.slane %v1289_v17, %v3563_v35  ;;  %v2315_v17 = vcombine.high %v4083_v6, %v4074_v22  ;;  %v1603_v22 = vcombine.low %v4066_v25, %v4060_v23  ;;  %v4242_v6 = vrot.slane %v2017_v59, %v3795_v4 }
 0x1aa   : > { %v2230_v25 = vcombine.low %v4091_v3, %v4088_v61  ;;  %v2100_v23 = vcombine.high %v4248_v1, %v5256_v2  ;;  %v4265_v11 = vpop.permute.xlu1 %1907  ;;  %v1535_v61 = vcombine.low %v4129_v50, %v4123_v29  ;;  %v5259_v59 = vcombine.low %v4017_v18, %v4020_v49  ;;  %v4307_v18 = vpop.permute.xlu0 %1879 }
 0x1ab   : > { %v1306_v41 = vcombine.high %v4198_v33, %v4201_v26  ;;  %1680 = vrot.lane.b32.xlu1 %v4206_v34, %s3191_s29  ;;  %v4233_v60 = vrot.slane %v2315_v17, %v3795_v4  ;;  %v4262_v5 = vrot.slane %v1603_v22, %v3795_v4  ;;  %v4304_v49 = vrot.slane %v2298_v38, %v3795_v4 }
 0x1ac   : > { %v4278_v17 = vrot.slane %v2230_v25, %v3795_v4  ;;  %v4299_v58 = vrot.slane %v1535_v61, %v3795_v4  ;;  %5261 = vst [vmem:[#allocation63_spill] sm:$0xff] %v4307_v18  ;;  %v2033_v25 = vcombine.high %v4029_v10, %v5256_v2  ;;  %v1373_v61 = vcombine.low %v4164_v52, %v4157_v8 }
 0x1ad   : > { %v4215_v30 = vrot.slane %v1306_v41, %v3795_v4  ;;  %v1389_v41 = vcombine.low %v4154_v47, %v4160_v42  ;;  %v1635_v3 = vcombine.high %v4262_v5, %v5256_v2  ;;  %v2330_v57 = vcombine.high %v4304_v49, %v5256_v2 }
 0x1ae   : > { %v4292_v29 = vpop.permute.xlu1 %1212  ;;  %v2262_v50 = vcombine.high %v4278_v17, %v5256_v2  ;;  %v1567_v22 = vcombine.high %v4299_v58, %v5256_v2  ;;  %v2263_v10 = vcombine.high %v4108_v48, %v5256_v2  ;;  %v4340_v55 = vrot.slane %v1373_v61, %v3795_v4 }
 0x1af   : > { %1414 = vrot.lane.b32.xlu0 %v4215_v30, %s3189_s28  ;;  %2153 = vrot.lane.b32.xlu1 %v4220_v56, %s3194_s9  ;;  %v4251_v36 = vrot.slane %v1389_v41, %v3795_v4  ;;  %v4289_v41 = vrot.slane %v5259_v59, %v3795_v4  ;;  %5260 = vst [vmem:[#allocation62_spill] sm:$0xff] %v4292_v29  ;;  %v5308_v29 = vld [vmem:[#allocation26_spill] sm:$0xff] }
 0x1b0   : > { %v1405_v48 = vcombine.high %v4340_v55, %v5256_v2 }
 0x1b1   : > { %v2032_v53 = vcombine.high %v4289_v41, %v5256_v2 }
 0x1b2   : > { %v4312_v39 = vpop.permute.xlu1 %1915 }
 0x1b3   : > { %1652 = vrot.lane.b32.xlu0 %v4228_v20, %s3191_s29  ;;  %2383 = vrot.lane.b32.xlu1 %v4233_v60, %s3194_s9 }
 0x1b6   : > { %v4329_v38 = vpop.permute.xlu1 %1903 }
 0x1b7   : > { %2125 = vrot.lane.b32.xlu0 %v4242_v6, %s3194_s9  ;;  %1450 = vrot.lane.b32.xlu1 %v4251_v36, %s3191_s29 }
 0x1bb   : > { %2133 = vrot.lane.b32.xlu0 %v2100_v23, %s3190_s6  ;;  %1688 = vrot.lane.b32.xlu1 %v4268_v51, %s3194_s9  ;;  %v1305_v23 = vcombine.low %v4198_v33, %v4201_v26  ;;  %v2331_v26 = vcombine.high %v4052_v43, %v5256_v2  ;;  %v4348_v33 = vpop.permute.xlu1 %1911  ;;  %v1568_v43 = vcombine.high %v4146_v37, %v5256_v2 }
 0x1bd   : > { %v4335_v59 = vrot.slane %v1305_v23, %v3795_v4  ;;  %v2332_v23 = vcombine.high %v4105_v54, %v5256_v2  ;;  %v1569_v54 = vcombine.high %v4228_v20, %v5256_v2  ;;  %v1060_v20 = vcombine.high %v3740_v28, %v3755_v40 }
 0x1be   : > { %v1290_v28 = vcombine.high %v4166_v24, %v4183_v62  ;;  %v5274_v24 = vld [vmem:[#allocation59_spill] sm:$0xff]  ;;  %v5276_v62 = vld [vmem:[#allocation44_spill] sm:$0xff] }
 0x1bf   : > { %1668 = vrot.lane.b32.xlu0 %v1635_v3, %s3190_s6  ;;  %2355 = vrot.lane.b32.xlu1 %v4283_v16, %s3194_s9  ;;  %v4326_v3 = vpop.permute.xlu0 %1184  ;;  %v1337_v52 = vcombine.high %v4335_v59, %v5256_v2 }
 0x1c0   : > { %5262 = vst [vmem:[#allocation64_spill] sm:$0xff] %v4326_v3 }
 0x1c3   : > { %2335 = vrot.lane.b32.xlu0 %v2262_v50, %s3190_s6  ;;  %2105 = vrot.lane.b32.xlu1 %v2032_v53, %s3190_s6  ;;  %v4343_v8 = vpop.permute.xlu0 %1875  ;;  %v1636_v50 = vcombine.high %v4078_v21, %v5256_v2  ;;  %v2264_v21 = vcombine.high %v4186_v9, %v5256_v2 }
 0x1c4   : > { %5263 = vst [vmem:[#allocation65_spill] sm:$0xff] %v4343_v8 }
 0x1c7   : > { %1640 = vrot.lane.b32.xlu0 %v1567_v22, %s3190_s6  ;;  %2363 = vrot.lane.b32.xlu1 %v2330_v57, %s3190_s6  ;;  %v4358_v53 = vpop.permute.xlu0 %1208  ;;  %v4361_v22 = vpop.permute.xlu1 %1216  ;;  %v2034_v57 = vcombine.high %v4171_v46, %v5256_v2  ;;  %v1406_v46 = vcombine.high %v4189_v44, %v5256_v2  ;;  %v2035_v44 = vcombine.high %v4242_v6, %v5256_v2 }
 0x1c8   : > { %5264 = vst [vmem:[#allocation66_spill] sm:$0xff] %v4358_v53  ;;  %5265 = vst [vmem:[#allocation67_spill] sm:$0xff] %v4361_v22  ;;  %v707_v6 = vcombine.high %v3927_v31, %v5256_v2  ;;  %v937_v31 = vcombine.high %v3944_v32, %v5256_v2  ;;  %v5306_v22 = vld [vmem:[#allocation47_spill] sm:$0xff] }
 0x1cb   : > { %2113 = vrot.lane.b32.xlu0 %v2033_v25, %s3192_s11  ;;  %2141 = vrot.lane.b32.xlu1 %v2101_v7, %s3192_s11  ;;  %v2102_v25 = vcombine.high %v4094_v0, %v5256_v2  ;;  %v4369_v37 = vpop.permute.xlu0 %1180  ;;  %v4376_v7 = vpop.permute.xlu1 %1919  ;;  %v1338_v0 = vcombine.high %v4215_v30, %v5256_v2 }
 0x1cc   : > { %5266 = vst [vmem:[#allocation68_spill] sm:$0xff] %v4369_v37 }
 0x1cf   : > { %2343 = vrot.lane.b32.xlu0 %v2263_v10, %s3192_s11  ;;  %2371 = vrot.lane.b32.xlu1 %v2331_v26, %s3192_s11  ;;  %v4384_v61 = vpop.permute.xlu0 %1883  ;;  %v4387_v9 = vpop.permute.xlu1 %1220  ;;  %v1637_v10 = vcombine.high %v4206_v34, %v5256_v2  ;;  %v1044_v34 = vcombine.high %v3729_v13, %v3745_v14  ;;  %v4424_v13 = vrot.slane %v1060_v20, %v3563_v35 }
 0x1d0   : > { %5267 = vst [vmem:[#allocation69_spill] sm:$0xff] %v4384_v61  ;;  %5268 = vst [vmem:[#allocation70_spill] sm:$0xff] %v4387_v9  ;;  %v5272_v14 = vcombine.high %v3934_v63, %v3937_v12  ;;  %v5275_v63 = vcombine.high %v3972_v45, %v5274_v24 }
 0x1d2   : > { %v621_v40 = vrot.slane %v5272_v14, %v3795_v4  ;;  %v851_v12 = vrot.slane %v5275_v63, %v3795_v4  ;;  %v5289_v63 = vld [vmem:[#allocation40_spill] sm:$0xff] }
 0x1d3   : > { %1410 = vrot.lane.b32.xlu0 %v1337_v52, %s3190_s6  ;;  %1438 = vrot.lane.b32.xlu1 %v1405_v48, %s3190_s6  ;;  %v4395_v30 = vpop.permute.xlu0 %1887  ;;  %v4400_v26 = vpop.permute.xlu1 %1923  ;;  %v2103_v52 = vcombine.high %v4220_v56, %v5256_v2  ;;  %v2333_v48 = vcombine.high %v4233_v60, %v5256_v2  ;;  %v1274_v60 = vcombine.high %v4143_v27, %v4168_v15 }
 0x1d4   : > { %5269 = vst [vmem:[#allocation71_spill] sm:$0xff] %v4395_v30  ;;  %v1177_v27 = vcombine.high %v5276_v62, %v5256_v2  ;;  %v5291_v62 = vld [vmem:[#allocation21_spill] sm:$0xff] }
 0x1d7   : > { %1648 = vrot.lane.b32.xlu0 %v1568_v43, %s3192_s11  ;;  %1676 = vrot.lane.b32.xlu1 %v1636_v50, %s3192_s11  ;;  %v4414_v43 = vpop.permute.xlu0 %1188  ;;  %v4417_v56 = vpop.permute.xlu1 %494  ;;  %v4421_v50 = vrot.slane %v1044_v34, %v3563_v35 }
 0x1d8   : > { %5270 = vst [vmem:[#allocation72_spill] sm:$0xff] %v4414_v43  ;;  %5271 = vst [vmem:[#allocation73_spill] sm:$0xff] %v4417_v56 }
 0x1d9   : > { %v1091_v32 = vcombine.low %v4421_v50, %v4424_v13 }
 0x1db   : > { %2121 = vrot.lane.b32.xlu0 %v2034_v57, %s3193_s17  ;;  %2149 = vrot.lane.b32.xlu1 %v2102_v25, %s3193_s17  ;;  %v4437_v57 = vpop.permute.xlu0 %1891  ;;  %v4441_v25 = vrot.slane %v1290_v28, %v3563_v35  ;;  %v4451_v15 = vpop.permute.xlu1 %743  ;;  %v1099_v45 = vrot.slane %v1091_v32, %v3795_v4 }
 0x1dc   : > { %5273 = vst [vmem:[#allocation74_spill] sm:$0xff] %v4437_v57  ;;  %5277 = vst [vmem:[#allocation59_spill] sm:$0xff] %v4451_v15  ;;  %v5311_v57 = vld [vmem:[#allocation54_spill] sm:$0xff] }
 0x1df   : > { %2351 = vrot.lane.b32.xlu0 %v2264_v21, %s3193_s17  ;;  %2379 = vrot.lane.b32.xlu1 %v2332_v23, %s3193_s17  ;;  %v4454_v21 = vrot.slane %v1274_v60, %v3563_v35  ;;  %v5286_v60 = vld [vmem:[#allocation27_spill] sm:$0xff] }
 0x1e1   : > { %v1321_v23 = vcombine.low %v4454_v21, %v4441_v25 }
 0x1e3   : > { %1418 = vrot.lane.b32.xlu0 %v1338_v0, %s3192_s11  ;;  %1446 = vrot.lane.b32.xlu1 %v1406_v46, %s3192_s11  ;;  %v4461_v0 = vpop.permute.xlu0 %739  ;;  %v1407_v46 = vcombine.high %v4251_v36, %v5256_v2  ;;  %v5280_v36 = vld [vmem:[#allocation61_spill] sm:$0xff] }
 0x1e4   : > { %5278 = vst [vmem:[#allocation44_spill] sm:$0xff] %v4461_v0  ;;  %v5281_v34 = vcombine.high %v4120_v19, %v5280_v36  ;;  %v5290_v19 = vld [vmem:[#allocation38_spill] sm:$0xff] }
 0x1e5   : > { %v659_v32 = vcombine.high %v5290_v19, %v5289_v63  ;;  %v5296_v63 = vld [vmem:[#allocation46_spill] sm:$0xff] }
 0x1e6   : > { %v1566_v20 = vrot.slane %v5281_v34, %v3795_v4  ;;  %v5297_v19 = vld [vmem:[#allocation42_spill] sm:$0xff] }
 0x1e7   : > { %1656 = vrot.lane.b32.xlu0 %v1569_v54, %s3193_s17  ;;  %1684 = vrot.lane.b32.xlu1 %v1637_v10, %s3193_s17  ;;  %v4466_v54 = vpop.permute.xlu1 %973  ;;  %v1329_v10 = vrot.slane %v1321_v23, %v3795_v4 }
 0x1e8   : > { %5279 = vst [vmem:[#allocation75_spill] sm:$0xff] %v4466_v54  ;;  %v869_v54 = vcombine.high %v851_v12, %v5256_v2  ;;  %v1570_v61 = vcombine.high %v1566_v20, %v5256_v2 }
 0x1eb   : > { %2129 = vrot.lane.b32.xlu0 %v2035_v44, %s3195_s19  ;;  %2157 = vrot.lane.b32.xlu1 %v2103_v52, %s3195_s19  ;;  %v4470_v44 = vpop.permute.xlu0 %711  ;;  %v1638_v52 = vcombine.high %v4268_v51, %v5256_v2  ;;  %v4482_v28 = vpop.permute.xlu1 %969 }
 0x1ec   : > { %5283 = vst [vmem:[#allocation61_spill] sm:$0xff] %v4482_v28 }
 0x1ef   : > { %2387 = vrot.lane.b32.xlu0 %v2333_v48, %s3195_s19  ;;  %747 = vrot.lane.b32.xlu1 %v707_v6, %s3192_s11  ;;  %v5282_v48 = vld [vmem:[#allocation48_spill] sm:$0xff]  ;;  %v4484_v14 = vpop.permute.xlu0 %941 }
 0x1f0   : > { %v1873_v6 = vcombine.high %v5282_v48, %v5256_v2  ;;  %5284 = vst [vmem:[#allocation48_spill] sm:$0xff] %v4484_v14  ;;  %v5294_v48 = vld [vmem:[#allocation39_spill] sm:$0xff] }
 0x1f3   : > { %715 = vrot.lane.b32.xlu0 %v621_v40, %s3189_s28  ;;  %977 = vrot.lane.b32.xlu1 %v937_v31, %s3192_s11  ;;  %v5285_v31 = vld [vmem:[#allocation25_spill] sm:$0xff] }
 0x1f4   : > { %v5287_v51 = vcombine.low %v5285_v31, %v5286_v60 }
 0x1f6   : > { %v4490_v24 = vrot.slane %v5287_v51, %v3795_v4  ;;  %v5295_v51 = vld [vmem:[#allocation37_spill] sm:$0xff] }
 0x1f7   : > { %945 = vrot.lane.b32.xlu0 %v851_v12, %s3189_s28  ;;  %1224 = vrot.lane.b32.xlu1 %v1177_v27, %s3193_s17  ;;  %v5292_v27 = vld [vmem:[#allocation22_spill] sm:$0xff]  ;;  %v643_v56 = vcombine.high %v5295_v51, %v5294_v48  ;;  %v5298_v51 = vld [vmem:[#allocation43_spill] sm:$0xff]  ;;  %v5303_v12 = vld [vmem:[#allocation52_spill] sm:$0xff] }
 0x1f8   : > { %5288 = vst [vmem:[#allocation25_spill] sm:$0xff] %v4490_v24  ;;  %v5293_v23 = vcombine.high %v5291_v62, %v5292_v27  ;;  %v393_v34 = vcombine.high %v4490_v24, %v5256_v2  ;;  %v889_v62 = vcombine.high %v5297_v19, %v5296_v63  ;;  %v2265_v27 = vcombine.high %v4283_v16, %v5256_v2  ;;  %v5300_v63 = vld [vmem:[#allocation23_spill] sm:$0xff]  ;;  %v5301_v19 = vld [vmem:[#allocation24_spill] sm:$0xff] }
 0x1f9   : > { %v4502_v36 = vpop.permute.xlu1 %2367  ;;  %v639_v24 = vcombine.high %v621_v40, %v5256_v2  ;;  %v4523_v48 = vrot.slane %v643_v56, %v3563_v35  ;;  %v5302_v40 = vcombine.high %v5300_v63, %v5301_v19  ;;  %v1109_v63 = vcombine.high %v1099_v45, %v5256_v2  ;;  %v5304_v19 = vld [vmem:[#allocation50_spill] sm:$0xff] }
 0x1fa   : > { %v4532_v16 = vrot.slane %v889_v62, %v3563_v35 }
 0x1fb   : > { %1192 = vrot.lane.b32.xlu0 %v1099_v45, %s3191_s29  ;;  %1454 = vrot.lane.b32.xlu1 %v1407_v46, %s3193_s17  ;;  %v1801_v46 = vrot.slane %v5293_v23, %v3795_v4  ;;  %v444_v37 = vrot.slane %v5302_v40, %v3795_v4  ;;  %v591_v40 = vcombine.high %v5304_v19, %v5303_v12  ;;  %v5310_v19 = vld [vmem:[#allocation58_spill] sm:$0xff] }
 0x1fd   : > { %v4573_v12 = vrot.slane %v591_v40, %v3563_v35 }
 0x1ff   : > { %1422 = vrot.lane.b32.xlu0 %v1329_v10, %s3191_s29  ;;  %1692 = vrot.lane.b32.xlu1 %v1638_v52, %s3195_s19  ;;  %v4500_v52 = vpop.permute.xlu0 %2137 }
 0x201   : > { %v4519_v43 = vpop.permute.xlu1 %1672 }
 0x203   : > { %1660 = vrot.lane.b32.xlu0 %v1566_v20, %s3194_s9  ;;  %1927 = vrot.lane.b32.xlu1 %v1873_v6, %s3195_s19  ;;  %v4511_v6 = vrot.slane %v659_v32, %v3563_v35  ;;  %v4517_v23 = vpop.permute.xlu0 %2109 }
 0x205   : > { %v690_v32 = vcombine.low %v4523_v48, %v4511_v6 }
 0x207   : > { %1895 = vrot.lane.b32.xlu0 %v1801_v46, %s3194_s9  ;;  %466 = vrot.lane.b32.xlu1 %v393_v34, %s3190_s6  ;;  %v5299_v34 = vld [vmem:[#allocation41_spill] sm:$0xff] }
 0x208   : > { %v873_v3 = vcombine.high %v5299_v34, %v5298_v51 }
 0x209   : > { %v4538_v56 = vpop.permute.xlu0 %2339 }
 0x20a   : > { %v4542_v51 = vrot.slane %v873_v3, %v3563_v35 }
 0x20b   : > { %2359 = vrot.lane.b32.xlu0 %v2265_v27, %s3195_s19  ;;  %719 = vrot.lane.b32.xlu1 %v639_v24, %s3192_s11  ;;  %v4545_v24 = vpop.permute.xlu1 %2145  ;;  %v698_v27 = vrot.slane %v690_v32, %v3795_v4  ;;  %v5305_v32 = vld [vmem:[#allocation51_spill] sm:$0xff] }
 0x20c   : > { %v920_v62 = vcombine.low %v4542_v51, %v4532_v16  ;;  %v575_v45 = vcombine.high %v5306_v22, %v5305_v32  ;;  %v5313_v32 = vld [vmem:[#allocation53_spill] sm:$0xff] }
 0x20e   : > { %v928_v3 = vrot.slane %v920_v62, %v3795_v4  ;;  %v4582_v22 = vrot.slane %v575_v45, %v3563_v35 }
 0x20f   : > { %498 = vrot.lane.b32.xlu0 %v444_v37, %s3189_s28  ;;  %949 = vrot.lane.b32.xlu1 %v869_v54, %s3192_s11  ;;  %v4559_v9 = vpop.permute.xlu1 %2375  ;;  %v1339_v54 = vcombine.high %v1329_v10, %v5256_v2  ;;  %v821_v10 = vcombine.high %v5311_v57, %v5310_v19  ;;  %v5314_v57 = vcombine.high %v4154_v47, %v4160_v42 }
 0x210   : > { %v622_v20 = vcombine.low %v4582_v22, %v4573_v12  ;;  %v1805_v42 = vcombine.high %v1801_v46, %v5256_v2  ;;  %v1092_v46 = vcombine.high %v4421_v50, %v4424_v13  ;;  %v938_v13 = vcombine.high %v928_v3, %v5256_v2 }
 0x211   : > { %v4551_v34 = vpop.permute.xlu0 %1644  ;;  %v1404_v40 = vrot.slane %v5314_v57, %v3795_v4 }
 0x213   : > { %751 = vrot.lane.b32.xlu0 %v698_v27, %s3191_s29  ;;  %1196 = vrot.lane.b32.xlu1 %v1109_v63, %s3193_s17  ;;  %v5307_v63 = vld [vmem:[#allocation28_spill] sm:$0xff] }
 0x214   : > { %v5309_v62 = vcombine.high %v5307_v63, %v5308_v29  ;;  %v4596_v63 = vrot.slane %v821_v10, %v3563_v35 }
 0x215   : > { %v4562_v28 = vpop.permute.xlu0 %2117 }
 0x216   : > { %v1174_v53 = vrot.slane %v5309_v62, %v3795_v4  ;;  %v5315_v62 = vcombine.high %v5285_v31, %v5286_v60 }
 0x217   : > { %981 = vrot.lane.b32.xlu0 %v928_v3, %s3191_s29  ;;  %1426 = vrot.lane.b32.xlu1 %v1339_v54, %s3193_s17  ;;  %v5312_v54 = vld [vmem:[#allocation55_spill] sm:$0xff] }
 0x218   : > { %v805_v18 = vcombine.high %v5313_v32, %v5312_v54  ;;  %v630_v32 = vrot.slane %v622_v20, %v3795_v4 }
 0x219   : > { %v4577_v30 = vpop.permute.xlu1 %1442  ;;  %v4587_v29 = vpop.permute.xlu0 %2347 }
 0x21a   : > { %v4606_v19 = vrot.slane %v805_v18, %v3563_v35  ;;  %v462_v18 = vcombine.high %v444_v37, %v5256_v2  ;;  %v1106_v37 = vrot.slane %v1092_v46, %v3795_v4 }
 0x21b   : > { %1228 = vrot.lane.b32.xlu0 %v1174_v53, %s3194_s9  ;;  %1664 = vrot.lane.b32.xlu1 %v1570_v61, %s3195_s19  ;;  %v376_v61 = vrot.slane %v5315_v62, %v3795_v4  ;;  %v708_v62 = vcombine.high %v698_v27, %v5256_v2 }
 0x21c   : > { %v852_v10 = vcombine.low %v4606_v19, %v4596_v63 }
 0x21d   : > { %v4598_v45 = vpop.permute.xlu1 %1680  ;;  %v394_v46 = vcombine.high %v376_v61, %v5256_v2 }
 0x21e   : > { %v860_v57 = vrot.slane %v852_v10, %v3795_v4 }
 0x21f   : > { %1458 = vrot.lane.b32.xlu0 %v1404_v40, %s3194_s9  ;;  %470 = vrot.lane.b32.xlu1 %v376_v61, %s3189_s28  ;;  %v5317_v61 = vld [vmem:[#allocation29_spill] sm:$0xff] }
 0x221   : > { %v4609_v47 = vpop.permute.xlu0 %1414  ;;  %v4614_v54 = vpop.permute.xlu1 %2153 }
 0x223   : > { %1899 = vrot.lane.b32.xlu0 %v1805_v42, %s3195_s19  ;;  %723 = vrot.lane.b32.xlu1 %v630_v32, %s3191_s29  ;;  %v1322_v42 = vcombine.high %v4454_v21, %v4441_v25  ;;  %v1178_v21 = vcombine.high %v1174_v53, %v5256_v2  ;;  %v691_v53 = vcombine.high %v4523_v48, %v4511_v6 }
 0x224   : > { %v921_v6 = vcombine.high %v4542_v51, %v4532_v16  ;;  %v623_v51 = vcombine.high %v4582_v22, %v4573_v12 }
 0x225   : > { %v4619_v31 = vpop.permute.xlu0 %1652  ;;  %v4622_v60 = vpop.permute.xlu1 %2383 }
 0x226   : > { %v935_v16 = vrot.slane %v921_v6, %v3795_v4  ;;  %v853_v6 = vcombine.high %v4606_v19, %v4596_v63 }
 0x227   : > { %502 = vrot.lane.b32.xlu0 %v462_v18, %s3192_s11  ;;  %953 = vrot.lane.b32.xlu1 %v860_v57, %s3191_s29  ;;  %v1336_v18 = vrot.slane %v1322_v42, %v3795_v4  ;;  %v640_v42 = vcombine.high %v630_v32, %v5256_v2  ;;  %v870_v32 = vcombine.high %v860_v57, %v5256_v2 }
 0x228   : > { %v1110_v57 = vcombine.high %v1106_v37, %v5256_v2 }
 0x229   : > { %v4629_v20 = vpop.permute.xlu0 %2125  ;;  %v4634_v35 = vpop.permute.xlu1 %1450 }
 0x22a   : > { %5316 = vst [vmem:[#allocation27_spill] sm:$0xff] %v4629_v20 }
 0x22b   : > { %755 = vrot.lane.b32.xlu0 %v708_v62, %s3193_s17  ;;  %1200 = vrot.lane.b32.xlu1 %v1106_v37, %s3194_s9  ;;  %v1408_v62 = vcombine.high %v1404_v40, %v5256_v2 }
 0x22d   : > { %v4639_v50 = vpop.permute.xlu0 %2133  ;;  %v4642_v10 = vpop.permute.xlu1 %1688 }
 0x22f   : > { %985 = vrot.lane.b32.xlu0 %v938_v13, %s3193_s17  ;;  %1430 = vrot.lane.b32.xlu1 %v1336_v18, %s3194_s9 }
 0x231   : > { %v1669_v25 = vpop.permute.xlu0 %1668  ;;  %v4648_v27 = vpop.permute.xlu1 %2355 }
 0x233   : > { %1232 = vrot.lane.b32.xlu0 %v1178_v21, %s3195_s19  ;;  %474 = vrot.lane.b32.xlu1 %v394_v46, %s3192_s11  ;;  %v5318_v21 = vld [vmem:[#allocation30_spill] sm:$0xff] }
 0x234   : > { %v5319_v8 = vcombine.low %v5317_v61, %v5318_v21 }
 0x235   : > { %v2336_v3 = vpop.permute.xlu0 %2335  ;;  %v2106_v20 = vpop.permute.xlu1 %2105 }
 0x236   : > { %v453_v46 = vrot.slane %v5319_v8, %v3795_v4  ;;  %v2160_v40 = vsel %vm521_vm5, %v4289_v41, %v2106_v20  ;;  %v2390_v63 = vsel %vm521_vm5, %v4278_v17, %v2336_v3 }
 0x237   : > { %1462 = vrot.lane.b32.xlu0 %v1408_v62, %s3195_s19  ;;  %727 = vrot.lane.b32.xlu1 %v640_v42, %s3193_s17  ;;  %v2161_v48 = vsel %vm523_vm6, %v2160_v40, %v4517_v23  ;;  %v705_v62 = vrot.slane %v691_v53, %v3795_v4  ;;  %v5320_v53 = vld [vmem:[#allocation31_spill] sm:$0xff]  ;;  %v5321_v40 = vld [vmem:[#allocation32_spill] sm:$0xff] }
 0x238   : > { %v463_v14 = vcombine.high %v453_v46, %v5256_v2 }
 0x239   : > { %v1641_v13 = vpop.permute.xlu0 %1640  ;;  %v4665_v15 = vpop.permute.xlu1 %2363 }
 0x23a   : > { %v1695_v12 = vsel %vm521_vm5, %v4299_v58, %v1641_v13 }
 0x23b   : > { %506 = vrot.lane.b32.xlu0 %v453_v46, %s3191_s29  ;;  %957 = vrot.lane.b32.xlu1 %v870_v32, %s3193_s17  ;;  %v5322_v32 = vcombine.low %v5320_v53, %v5321_v40 }
 0x23d   : > { %v2114_v8 = vpop.permute.xlu0 %2113  ;;  %v4675_v41 = vpop.permute.xlu1 %2141  ;;  %v385_v0 = vrot.slane %v5322_v32, %v3795_v4  ;;  %v1696_v32 = vsel %vm523_vm6, %v1695_v12, %v4551_v34  ;;  %v2391_v34 = vsel %vm523_vm6, %v2390_v63, %v4538_v56 }
 0x23e   : > { %v2162_v20 = vsel %vm525_vm7, %v2161_v48, %v2114_v8  ;;  %v1340_v48 = vcombine.high %v1336_v18, %v5256_v2  ;;  %v637_v8 = vrot.slane %v623_v51, %v3795_v4 }
 0x23f   : > { %759 = vrot.lane.b32.xlu0 %v705_v62, %s3194_s9  ;;  %1204 = vrot.lane.b32.xlu1 %v1110_v57, %s3195_s19  ;;  %v1702_v57 = vsel %vm521_vm5, %v4262_v5, %v1669_v25  ;;  %v867_v5 = vrot.slane %v853_v6, %v3795_v4  ;;  %v2163_v17 = vsel %vm527_vm8, %v2162_v20, %v4562_v28 }
 0x240   : > { %v1703_v19 = vsel %vm523_vm6, %v1702_v57, %v4519_v43  ;;  %v709_v43 = vcombine.high %v705_v62, %v5256_v2  ;;  %v939_v20 = vcombine.high %v935_v16, %v5256_v2  ;;  %v641_v12 = vcombine.high %v637_v8, %v5256_v2 }
 0x241   : > { %v2344_v42 = vpop.permute.xlu0 %2343  ;;  %v4684_v23 = vpop.permute.xlu1 %2371 }
 0x242   : > { %v2392_v46 = vsel %vm525_vm7, %v2391_v34, %v2344_v42 }
 0x243   : > { %989 = vrot.lane.b32.xlu0 %v935_v16, %s3194_s9  ;;  %478 = vrot.lane.b32.xlu1 %v385_v0, %s3191_s29  ;;  %v2393_v56 = vsel %vm527_vm8, %v2392_v46, %v4587_v29 }
 0x245   : > { %v1411_v37 = vpop.permute.xlu0 %1410  ;;  %v1439_v22 = vpop.permute.xlu1 %1438 }
 0x246   : > { %v1465_v62 = vsel %vm521_vm5, %v4335_v59, %v1411_v37  ;;  %v5323_v37 = vcombine.high %v5317_v61, %v5318_v21  ;;  %v871_v21 = vcombine.high %v867_v5, %v5256_v2 }
 0x247   : > { %1434 = vrot.lane.b32.xlu0 %v1340_v48, %s3195_s19  ;;  %731 = vrot.lane.b32.xlu1 %v637_v8, %s3194_s9  ;;  %v1466_v16 = vsel %vm523_vm6, %v1465_v62, %v4609_v47  ;;  %v5324_v47 = vcombine.high %v5320_v53, %v5321_v40  ;;  %v5325_v62 = vld [vmem:[#allocation35_spill] sm:$0xff] }
 0x248   : > { %v460_v8 = vrot.slane %v5323_v37, %v3795_v4 }
 0x249   : > { %v1649_v18 = vpop.permute.xlu0 %1648  ;;  %v1677_v58 = vpop.permute.xlu1 %1676 }
 0x24a   : > { %v1697_v13 = vsel %vm525_vm7, %v1696_v32, %v1649_v18  ;;  %v1704_v25 = vsel %vm525_vm7, %v1703_v19, %v1677_v58  ;;  %v392_v32 = vrot.slane %v5324_v47, %v3795_v4 }
 0x24b   : > { %510 = vrot.lane.b32.xlu0 %v463_v14, %s3193_s17  ;;  %961 = vrot.lane.b32.xlu1 %v867_v5, %s3194_s9  ;;  %v395_v14 = vcombine.high %v385_v0, %v5256_v2  ;;  %v1472_v0 = vsel %vm521_vm5, %v4340_v55, %v1439_v22  ;;  %v2397_v55 = vsel %vm521_vm5, %v4304_v49, %v4665_v15 }
 0x24c   : > { %v1473_v22 = vsel %vm523_vm6, %v1472_v0, %v4577_v30  ;;  %v2398_v30 = vsel %vm523_vm6, %v2397_v55, %v4502_v36  ;;  %v1698_v15 = vsel %vm527_vm8, %v1697_v13, %v4619_v31  ;;  %v1705_v63 = vsel %vm527_vm8, %v1704_v25, %v4598_v45 }
 0x24d   : > { %v2122_v3 = vpop.permute.xlu0 %2121  ;;  %v4720_v51 = vpop.permute.xlu1 %2149  ;;  %v2399_v53 = vsel %vm525_vm7, %v2398_v30, %v4684_v23  ;;  %v464_v45 = vcombine.high %v460_v8, %v5256_v2  ;;  %v5327_v30 = vld [vmem:[#allocation48_spill] sm:$0xff] }
 0x24e   : > { %v4723_v48 = vsel %vm529_vm9, %v2163_v17, %v2122_v3  ;;  %v2400_v31 = vsel %vm527_vm8, %v2399_v53, %v4559_v9 }
 0x24f   : > { %763 = vrot.lane.b32.xlu0 %v709_v43, %s3195_s19  ;;  %482 = vrot.lane.b32.xlu1 %v395_v14, %s3193_s17 }
 0x251   : > { %v2352_v28 = vpop.permute.xlu0 %2351  ;;  %v2380_v42 = vpop.permute.xlu1 %2379 }
 0x252   : > { %v2394_v6 = vsel %vm529_vm9, %v2393_v56, %v2352_v28  ;;  %v2401_v13 = vsel %vm529_vm9, %v2400_v31, %v2380_v42  ;;  %v2167_v56 = vsel %vm521_vm5, %v4248_v1, %v4639_v50  ;;  %v1937_v42 = vsel %vm521_vm5, %v5325_v62, %v4329_v38 }
 0x253   : > { %993 = vrot.lane.b32.xlu0 %v939_v20, %s3195_s19  ;;  %v4740_v29 = vsel %vm531_vm10, %v2394_v6, %v4648_v27  ;;  %735 = vrot.lane.b32.xlu1 %v641_v12, %s3195_s19  ;;  %v2402_v34 = vsel %vm531_vm10, %v2401_v13, %v4622_v60  ;;  %v2168_v60 = vsel %vm523_vm6, %v2167_v56, %v4500_v52 }
 0x254   : > { %v2169_v6 = vsel %vm525_vm7, %v2168_v60, %v4675_v41  ;;  %v1938_v1 = vsel %vm523_vm6, %v1937_v42, %v4265_v11  ;;  %v5335_v42 = vld [vmem:[#allocation27_spill] sm:$0xff] }
 0x255   : > { %v1419_v59 = vpop.permute.xlu0 %1418  ;;  %v1447_v27 = vpop.permute.xlu1 %1446  ;;  %v2170_v50 = vsel %vm527_vm8, %v2169_v6, %v4545_v24 }
 0x256   : > { %v1467_v57 = vsel %vm525_vm7, %v1466_v16, %v1419_v59  ;;  %v1474_v18 = vsel %vm525_vm7, %v1473_v22, %v1447_v27  ;;  %v1939_v16 = vsel %vm525_vm7, %v1938_v1, %v4348_v33  ;;  %v2171_v38 = vsel %vm529_vm9, %v2170_v50, %v4720_v51  ;;  %v5326_v27 = vld [vmem:[#allocation57_spill] sm:$0xff] }
 0x257   : > { %514 = vrot.lane.b32.xlu0 %v460_v8, %s3194_s9  ;;  %486 = vrot.lane.b32.xlu1 %v392_v32, %s3194_s9  ;;  %v4764_v49 = vsel %vm527_vm8, %v1474_v18, %v4634_v35  ;;  %v396_v35 = vcombine.high %v392_v32, %v5256_v2  ;;  %v1940_v37 = vsel %vm527_vm8, %v1939_v16, %v4312_v39  ;;  %v5336_v1 = vld [vmem:[#allocation69_spill] sm:$0xff] }
 0x258   : > { %v2172_v11 = vsel %vm531_vm10, %v2171_v38, %v4614_v54  ;;  %v1941_v24 = vsel %vm529_vm9, %v1940_v37, %v4376_v7  ;;  %v766_v39 = vsel %vm521_vm5, %v5326_v27, %v4470_v44  ;;  %v5337_v38 = vld [vmem:[#allocation71_spill] sm:$0xff]  ;;  %v5338_v37 = vld [vmem:[#allocation74_spill] sm:$0xff] }
 0x259   : > { %v1657_v61 = vpop.permute.xlu0 %1656  ;;  %v1685_v40 = vpop.permute.xlu1 %1684  ;;  %v1942_v51 = vsel %vm531_vm10, %v1941_v24, %v4400_v26 }
 0x25a   : > { %v1699_v58 = vsel %vm529_vm9, %v1698_v15, %v1657_v61  ;;  %v1706_v19 = vsel %vm529_vm9, %v1705_v63, %v1685_v40  ;;  %v5328_v15 = vld [vmem:[#allocation60_spill] sm:$0xff]  ;;  %v5330_v63 = vld [vmem:[#allocation45_spill] sm:$0xff] }
 0x25b   : > { %965 = vrot.lane.b32.xlu0 %v871_v21, %s3195_s19  ;;  %490 = vrot.lane.b32.xlu1 %v396_v35, %s3195_s19  ;;  %v4782_v36 = vsel %vm531_vm10, %v1706_v19, %v4642_v10  ;;  %v996_v44 = vsel %vm521_vm5, %v5328_v15, %v5327_v30  ;;  %v5329_v40 = vld [vmem:[#allocation44_spill] sm:$0xff]  ;;  %v5331_v35 = vld [vmem:[#allocation59_spill] sm:$0xff] }
 0x25d   : > { %v4786_v23 = vpop.permute.xlu0 %2129  ;;  %v2158_v5 = vpop.permute.xlu1 %2157 }
 0x25e   : > { %v2173_v55 = vsel %vm533_vm12, %v2172_v11, %v2158_v5 }
 0x25f   : > { %518 = vrot.lane.b32.xlu0 %v464_v45, %s3195_s19 }
 0x261   : > { %v2388_v25 = vpop.permute.xlu0 %2387  ;;  %v748_v10 = vpop.permute.xlu1 %747 }
 0x262   : > { %v2403_v17 = vsel %vm533_vm12, %v2402_v34, %v2388_v25 }
 0x263   : > { %2933 = vmatprep.subr.msk.mxu0 %vm2428_vm11, %v2403_v17 }
 0x265   : > { %v716_v9 = vpop.permute.xlu0 %715  ;;  %v4795_v3 = vpop.permute.xlu1 %977 }
 0x266   : > { %v767_v54 = vsel %vm523_vm6, %v766_v39, %v716_v9  ;;  %v5332_v9 = vld [vmem:[#allocation65_spill] sm:$0xff] }
 0x269   : > { %v946_v43 = vpop.permute.xlu0 %945  ;;  %v4797_v46 = vpop.permute.xlu1 %1224 }
 0x26a   : > { %v997_v21 = vsel %vm523_vm6, %v996_v44, %v946_v43  ;;  %v5333_v43 = vld [vmem:[#allocation33_spill] sm:$0xff] }
 0x26b   : > { %v1930_v56 = vsel %vm521_vm5, %v5333_v43, %v5332_v9 }
 0x26d   : > { %v4799_v14 = vpop.permute.xlu0 %1192  ;;  %v4804_v28 = vpop.permute.xlu1 %1454 }
 0x26e   : > { %v1476_v30 = vsel %vm529_vm9, %v4764_v49, %v4804_v28 }
 0x271   : > { %v1423_v20 = vpop.permute.xlu0 %1422  ;;  %v4813_v12 = vpop.permute.xlu1 %1692 }
 0x272   : > { %v4816_v0 = vsel %vm527_vm8, %v1467_v57, %v1423_v20  ;;  %v2425_v57 = vrot.slane %v2173_v55, 4  ;;  %v5334_v20 = vld [vmem:[#allocation63_spill] sm:$0xff] }
 0x273   : > { %v1931_v62 = vsel %vm523_vm6, %v1930_v56, %v5334_v20  ;;  %v5339_v56 = vld [vmem:[#allocation66_spill] sm:$0xff] }
 0x274   : > { %v1932_v50 = vsel %vm525_vm7, %v1931_v62, %v5336_v1  ;;  %v5340_v20 = vld [vmem:[#allocation34_spill] sm:$0xff] }
 0x275   : > { %v1661_v52 = vpop.permute.xlu0 %1660  ;;  %v1928_v59 = vpop.permute.xlu1 %1927  ;;  %v1242_v62 = vsel %vm521_vm5, %v5340_v20, %v5339_v56  ;;  %v5341_v1 = vld [vmem:[#allocation62_spill] sm:$0xff] }
 0x276   : > { %v4827_v41 = vsel %vm531_vm10, %v1699_v58, %v1661_v52  ;;  %v1943_v22 = vsel %vm533_vm12, %v1942_v51, %v1928_v59  ;;  %v1933_v59 = vsel %vm527_vm8, %v1932_v50, %v5337_v38  ;;  %v5342_v50 = vld [vmem:[#allocation67_spill] sm:$0xff] }
 0x277   : > { %v2436_v26 = vsel %vm2428_vm11, %v1943_v22, %v2425_v57  ;;  %v1934_v11 = vsel %vm529_vm9, %v1933_v59, %v5338_v37  ;;  %v5345_v37 = vld [vmem:[#allocation70_spill] sm:$0xff] }
 0x279   : > { %v1896_v8 = vpop.permute.xlu0 %1895  ;;  %v4836_v33 = vpop.permute.xlu1 %466 }
 0x27a   : > { %v1935_v55 = vsel %vm531_vm10, %v1934_v11, %v1896_v8  ;;  %v1708_v8 = vsel %vm533_vm12, %v4782_v36, %v4813_v12 }
 0x27b   : > { %v2419_v15 = vrot.slane %v1708_v8, 4  ;;  %v5348_v8 = vld [vmem:[#allocation36_spill] sm:$0xff] }
 0x27d   : > { %v2360_v47 = vpop.permute.xlu0 %2359  ;;  %v720_v32 = vpop.permute.xlu1 %719 }
 0x27e   : > { %v2396_v7 = vsel %vm533_vm12, %v4740_v29, %v2360_v47  ;;  %v4848_v18 = vsel %vm525_vm7, %v767_v54, %v720_v32  ;;  %v773_v29 = vsel %vm521_vm5, %v5330_v63, %v5329_v40 }
 0x27f   : > { %2934 = vmatpush1.msk.msra.mxu0 %vm2428_vm11, %v2396_v7  ;;  %v774_v19 = vsel %vm523_vm6, %v773_v29, %v5331_v35 }
 0x280   : > { %2472 = vmatprep.subr.mxu0 %v2436_v26  ;;  %v775_v31 = vsel %vm525_vm7, %v774_v19, %v748_v10  ;;  %v2165_v10 = vsel %vm531_vm10, %v4723_v48, %v5335_v42 }
 0x281   : > { %v4855_v61 = vpop.permute.xlu0 %498  ;;  %v950_v53 = vpop.permute.xlu1 %949  ;;  %v2166_v52 = vsel %vm533_vm12, %v2165_v10, %v4786_v23 }
 0x282   : > { %v4862_v58 = vsel %vm525_vm7, %v997_v21, %v950_v53  ;;  %v2424_v24 = vrot.slane %v2166_v52, 4  ;;  %v5344_v52 = vld [vmem:[#allocation56_spill] sm:$0xff] }
 0x285   : > { %v752_v45 = vpop.permute.xlu0 %751  ;;  %v4867_v13 = vpop.permute.xlu1 %1196 }
 0x286   : > { %v4870_v5 = vsel %vm527_vm8, %v775_v31, %v752_v45 }
 0x289   : > { %v4872_v25 = vpop.permute.xlu0 %981  ;;  %v1427_v34 = vpop.permute.xlu1 %1426 }
 0x28a   : > { %v1469_v28 = vsel %vm529_vm9, %v4816_v0, %v1427_v34  ;;  %v5343_v34 = vld [vmem:[#allocation61_spill] sm:$0xff] }
 0x28b   : > { %v1003_v38 = vsel %vm521_vm5, %v5344_v52, %v5343_v34 }
 0x28d   : > { %v1229_v17 = vpop.permute.xlu0 %1228  ;;  %v1665_v60 = vpop.permute.xlu1 %1664 }
 0x28e   : > { %v1701_v31 = vsel %vm533_vm12, %v4827_v41, %v1665_v60  ;;  %v1243_v41 = vsel %vm523_vm6, %v1242_v62, %v5341_v1 }
 0x28f   : > { %v2418_v45 = vrot.slane %v1701_v31, 4  ;;  %v1244_v0 = vsel %vm525_vm7, %v1243_v41, %v5342_v50  ;;  %v5353_v41 = vld [vmem:[#allocation49_spill] sm:$0xff] }
 0x290   : > { %v1245_v11 = vsel %vm527_vm8, %v1244_v0, %v5345_v37 }
 0x291   : > { %v1459_v6 = vpop.permute.xlu0 %1458  ;;  %v4886_v16 = vpop.permute.xlu1 %470 }
 0x292   : > { %v1477_v44 = vsel %vm531_vm10, %v1476_v30, %v1459_v6 }
 0x295   : > { %v1900_v51 = vpop.permute.xlu0 %1899  ;;  %v4893_v48 = vpop.permute.xlu1 %723 }
 0x296   : > { %v1936_v22 = vsel %vm533_vm12, %v1935_v55, %v1900_v51  ;;  %v5346_v55 = vld [vmem:[#allocation75_spill] sm:$0xff]  ;;  %v769_v20 = vsel %vm527_vm8, %v4848_v18, %v4893_v48 }
 0x297   : > { %v2435_v27 = vsel %vm2428_vm11, %v1936_v22, %v2424_v24  ;;  %v1246_v24 = vsel %vm529_vm9, %v1245_v11, %v4797_v46  ;;  %v1004_v51 = vsel %vm523_vm6, %v1003_v38, %v5346_v55 }
 0x298   : > { %2473 = vmatpush1.msra.mxu0 %v2435_v27  ;;  %v1247_v22 = vsel %vm531_vm10, %v1246_v24, %v1229_v17 }
 0x299   : > { %v4897_v23 = vpop.permute.xlu0 %502  ;;  %v4899_v39 = vpop.permute.xlu1 %953 }
 0x29d   : > { %v4901_v57 = vpop.permute.xlu0 %755  ;;  %v1201_v47 = vpop.permute.xlu1 %1200 }
 0x2a1   : > { %v986_v54 = vpop.permute.xlu0 %985  ;;  %v1431_v32 = vpop.permute.xlu1 %1430 }
 0x2a2   : > { %v1470_v9 = vsel %vm531_vm10, %v1469_v28, %v1431_v32  ;;  %v5347_v32 = vld [vmem:[#allocation68_spill] sm:$0xff] }
 0x2a3   : > { %v1235_v30 = vsel %vm521_vm5, %v5348_v8, %v5347_v32  ;;  %v2437_v8 = vld [vmem:[#allocation5] sm:$0xf] }
 0x2a5   : > { %v1233_v7 = vpop.permute.xlu0 %1232  ;;  %v4906_v26 = vpop.permute.xlu1 %474 }
 0x2a9   : > { %v1463_v21 = vpop.permute.xlu0 %1462  ;;  %v728_v53 = vpop.permute.xlu1 %727 }
 0x2aa   : > { %v1478_v40 = vsel %vm533_vm12, %v1477_v44, %v1463_v21  ;;  %v1248_v44 = vsel %vm533_vm12, %v1247_v22, %v1233_v7 }
 0x2ab   : > { %v2434_v63 = vsel %vm2428_vm11, %v1478_v40, %v2419_v15  ;;  %v1005_v15 = vsel %vm525_vm7, %v1004_v51, %v4795_v3  ;;  %v2413_v17 = vrot.slane %v1248_v44, 4 }
 0x2ac   : > { %2474 = vmatprep.subr.mxu0 %v2434_v63  ;;  %v1006_v40 = vsel %vm527_vm8, %v1005_v15, %v4872_v25  ;;  %v5349_v63 = vld [vmem:[#allocation64_spill] sm:$0xff] }
 0x2ad   : > { %v4914_v29 = vpop.permute.xlu0 %506  ;;  %v958_v35 = vpop.permute.xlu1 %957  ;;  %v1007_v46 = vsel %vm529_vm9, %v1006_v40, %v986_v54  ;;  %v1236_v31 = vsel %vm523_vm6, %v1235_v30, %v5349_v63  ;;  %v5355_v30 = vld [vmem:[#allocation15_spill] sm:$0xff]  ;;  %v5356_v15 = vld [vmem:[#allocation16_spill] sm:$0xff]  ;;  %v5359_v40 = vld [vmem:[#allocation17_spill] sm:$0xff] }
 0x2b1   : > { %v760_v36 = vpop.permute.xlu0 %759  ;;  %v1205_v12 = vpop.permute.xlu1 %1204 }
 0x2b5   : > { %v990_v19 = vpop.permute.xlu0 %989  ;;  %v479_v49 = vpop.permute.xlu1 %478 }
 0x2b6   : > { %v1008_v28 = vsel %vm531_vm10, %v1007_v46, %v990_v19  ;;  %v5351_v19 = vld [vmem:[#allocation25_spill] sm:$0xff] }
 0x2b7   : > { %v522_v62 = vsel %vm521_vm5, %v5351_v19, %v4836_v33 }
 0x2b9   : > { %v1435_v43 = vpop.permute.xlu0 %1434  ;;  %v732_v42 = vpop.permute.xlu1 %731 }
 0x2ba   : > { %v1471_v10 = vsel %vm533_vm12, %v1470_v9, %v1435_v43  ;;  %v5350_v9 = vld [vmem:[#allocation72_spill] sm:$0xff] }
 0x2bb   : > { %v2433_v6 = vsel %vm2428_vm11, %v1471_v10, %v2418_v45  ;;  %v1237_v43 = vsel %vm525_vm7, %v1236_v31, %v5350_v9  ;;  %v5361_v31 = vld [vmem:[#allocation13_spill] sm:$0xff]  ;;  %v5364_v9 = vld [vmem:[#allocation12_spill] sm:$0xff] }
 0x2bc   : > { %2475 = vmatpush1.msra.mxu0 %v2433_v6  ;;  %v1238_v7 = vsel %vm527_vm8, %v1237_v43, %v4799_v14  ;;  %v770_v6 = vsel %vm529_vm9, %v769_v20, %v728_v53  ;;  %v5352_v14 = vld [vmem:[#allocation73_spill] sm:$0xff]  ;;  %v5365_v43 = vld [vmem:[#allocation19_spill] sm:$0xff] }
 0x2bd   : > { %v511_v60 = vpop.permute.xlu0 %510  ;;  %v962_v59 = vpop.permute.xlu1 %961  ;;  %v1239_v54 = vsel %vm529_vm9, %v1238_v7, %v4867_v13  ;;  %v535_v50 = vsel %vm521_vm5, %v5353_v41, %v5352_v14  ;;  %v524_v13 = vsel %vm523_vm6, %v522_v62, %v4886_v16  ;;  %v771_v18 = vsel %vm531_vm10, %v770_v6, %v732_v42 }
 0x2be   : > { %v1240_v10 = vsel %vm531_vm10, %v1239_v54, %v1201_v47  ;;  %v536_v33 = vsel %vm523_vm6, %v535_v50, %v4855_v61  ;;  %v999_v47 = vsel %vm527_vm8, %v4862_v58, %v4899_v39  ;;  %v526_v53 = vsel %vm525_vm7, %v524_v13, %v4906_v26 }
 0x2bf   : > { %v1241_v0 = vsel %vm533_vm12, %v1240_v10, %v1205_v12  ;;  %v537_v16 = vsel %vm525_vm7, %v536_v33, %v4897_v23  ;;  %v777_v12 = vsel %vm529_vm9, %v4870_v5, %v4901_v57  ;;  %v1000_v42 = vsel %vm529_vm9, %v999_v47, %v958_v35 }
 0x2c0   : > { %v528_v61 = vsel %vm527_vm8, %v526_v53, %v479_v49  ;;  %v2412_v52 = vrot.slane %v1241_v0, 4  ;;  %v778_v38 = vsel %vm531_vm10, %v777_v12, %v760_v36  ;;  %v1001_v58 = vsel %vm531_vm10, %v1000_v42, %v962_v59 }
 0x2c1   : > { %v764_v27 = vpop.permute.xlu0 %763  ;;  %v483_v21 = vpop.permute.xlu1 %482  ;;  %v538_v57 = vsel %vm527_vm8, %v537_v16, %v4914_v29  ;;  %v5354_v29 = vld [vmem:[#allocation20_spill] sm:$0xff]  ;;  %v5367_v7 = vcombine.high %v5355_v30, %v5356_v15  ;;  %v5370_v50 = vcombine.high %v5364_v9, %v5365_v43 }
 0x2c2   : > { %v530_v39 = vsel %vm529_vm9, %v528_v61, %v483_v21  ;;  %v779_v37 = vsel %vm533_vm12, %v778_v38, %v764_v27  ;;  %v539_v49 = vsel %vm529_vm9, %v538_v57, %v511_v60  ;;  %v5357_v60 = vcombine.low %v5355_v30, %v5356_v15  ;;  %v5358_v21 = vld [vmem:[#allocation14_spill] sm:$0xff] }
 0x2c3   : > { %v2407_v55 = vrot.slane %v779_v37, 4  ;;  %v5360_v46 = vcombine.low %v5358_v21, %v5359_v40  ;;  %v5369_v14 = vcombine.high %v5358_v21, %v5359_v40  ;;  %v2634_v13 = vrot.slane %v5370_v50, %v5354_v29 }
 0x2c4   : > { %v2679_v44 = vrot.slane %v5357_v60, %v5354_v29 }
 0x2c5   : > { %v994_v45 = vpop.permute.xlu0 %993  ;;  %v736_v56 = vpop.permute.xlu1 %735  ;;  %v2611_v63 = vrot.slane %v5360_v46, %v5354_v29  ;;  %v2618_v41 = vrot.slane %v5369_v14, %v5354_v29 }
 0x2c6   : > { %v1009_v3 = vsel %vm533_vm12, %v1008_v28, %v994_v45  ;;  %v772_v34 = vsel %vm533_vm12, %v771_v18, %v736_v56  ;;  %v5366_v56 = vcombine.low %v5364_v9, %v5365_v43 }
 0x2c7   : > { %v2432_v25 = vsel %vm2428_vm11, %v1009_v3, %v2413_v17  ;;  %v2406_v11 = vrot.slane %v772_v34, 4  ;;  %v5362_v17 = vld [vmem:[#allocation18_spill] sm:$0xff]  ;;  %v2651_v33 = vcombine.low %v2618_v41, %v2634_v13  ;;  %v2652_v47 = vcombine.high %v2618_v41, %v2634_v13 }
 0x2c8   : > { %2476 = vmatprep.subr.mxu0 %v2432_v25  ;;  %v5363_v28 = vcombine.low %v5361_v31, %v5362_v17  ;;  %v2627_v3 = vrot.slane %v5366_v56, %v5354_v29  ;;  %v2686_v25 = vrot.slane %v5367_v7, %v5354_v29  ;;  %v5368_v54 = vcombine.high %v5361_v31, %v5362_v17 }
 0x2c9   : > { %v515_v1 = vpop.permute.xlu0 %514  ;;  %v487_v48 = vpop.permute.xlu1 %486  ;;  %v2659_v38 = vrot.slane %v2651_v33, %v3795_v4  ;;  %v2666_v37 = vrot.slane %v2652_v47, %v3795_v4 }
 0x2ca   : > { %v532_v23 = vsel %vm531_vm10, %v530_v39, %v487_v48  ;;  %v540_v51 = vsel %vm531_vm10, %v539_v49, %v515_v1  ;;  %v2695_v45 = vrot.slane %v5363_v28, %v5354_v29  ;;  %v2702_v20 = vrot.slane %v5368_v54, %v5354_v29 }
 0x2cb   : > { %v2635_v62 = vcombine.low %v2611_v63, %v2627_v3  ;;  %v2636_v6 = vcombine.high %v2611_v63, %v2627_v3  ;;  %v2669_v39 = vcombine.high %v2659_v38, %v5256_v2 }
 0x2cc   : > { %v2703_v19 = vcombine.low %v2679_v44, %v2695_v45  ;;  %v2704_v10 = vcombine.high %v2679_v44, %v2695_v45  ;;  %v2719_v1 = vcombine.low %v2686_v25, %v2702_v20  ;;  %v2720_v0 = vcombine.high %v2686_v25, %v2702_v20 }
 0x2cd   : > { %v966_v26 = vpop.permute.xlu0 %965  ;;  %v491_v24 = vpop.permute.xlu1 %490  ;;  %v2643_v48 = vrot.slane %v2635_v62, %v3795_v4  ;;  %v2650_v12 = vrot.slane %v2636_v6, %v3795_v4 }
 0x2ce   : > { %v1002_v5 = vsel %vm533_vm12, %v1001_v58, %v966_v26  ;;  %v534_v35 = vsel %vm533_vm12, %v532_v23, %v491_v24  ;;  %v2711_v18 = vrot.slane %v2703_v19, %v3795_v4  ;;  %v2718_v16 = vrot.slane %v2704_v10, %v3795_v4 }
 0x2cf   : > { %v2431_v36 = vsel %vm2428_vm11, %v1002_v5, %v2412_v52  ;;  %v2429_v59 = vsel %vm2428_vm11, %v534_v35, %v2406_v11  ;;  %v2667_v34 = vcombine.high %v2643_v48, %v5256_v2  ;;  %v2668_v61 = vcombine.high %v2650_v12, %v5256_v2 }
 0x2d0   : > { %2477 = vmatpush1.msra.mxu0 %v2431_v36  ;;  %v2735_v53 = vcombine.high %v2711_v18, %v5256_v2  ;;  %v2736_v42 = vcombine.high %v2718_v16, %v5256_v2  ;;  %v2727_v52 = vrot.slane %v2719_v1, %v3795_v4  ;;  %v2734_v26 = vrot.slane %v2720_v0, %v3795_v4  ;;  %v2521_v36 = vld [vmem:[#allocation7] sm:$0xf] }
 0x2d1   : > { %v519_v22 = vpop.permute.xlu0 %518  ;;  %2740 = vrot.lane.b32.xlu0 %v2667_v34, %s3190_s6  ;;  %v2670_v23 = vcombine.high %v2666_v37, %v5256_v2 }
 0x2d2   : > { %v541_v27 = vsel %vm533_vm12, %v540_v51, %v519_v22  ;;  %2768 = vrot.lane.b32.xlu1 %v2735_v53, %s3190_s6  ;;  %v2737_v58 = vcombine.high %v2727_v52, %v5256_v2  ;;  %v2738_v11 = vcombine.high %v2734_v26, %v5256_v2 }
 0x2d3   : > { %v2430_v32 = vsel %vm2428_vm11, %v541_v27, %v2407_v55 }
 0x2d4   : > { %2478 = vmatprep.subr.mxu0 %v2430_v32 }
 0x2d5   : > { %2479 = vmatpush1.msra.mxu0 %v2429_v59  ;;  %2744 = vrot.lane.b32.xlu0 %v2650_v12, %s3189_s28 }
 0x2d6   : > { %2935 = vmatmul.mubr.msk.f32.vlgmr.msra.gmra.mxu0 %vm2438_vm13, %v2437_v8  ;;  %2772 = vrot.lane.b32.xlu1 %v2718_v16, %s3189_s28  ;;  %s3112_s28 = sshll.u32 %s3196_s30, 4  ;;  %s3113_s28 = int_to_ptr.vmem [resolvable:$false] %s3112_s28 }
 0x2d7   : > { %s3114_s16 = scalar_lea.vmem %s3113_s28, 256  ;;  %p3115_p9 = scmp.lt.s32.totalorder %s2832_s4, %s3113_s28 }
 0x2d8   : > { %p3116_p10 = scmp.lt.s32.totalorder %s3114_s16, %s3108_s26 }
 0x2d9   : > { %2748 = vrot.lane.b32.xlu0 %v2668_v61, %s3192_s11 }
 0x2da   : > { %2776 = vrot.lane.b32.xlu1 %v2736_v42, %s3192_s11  ;;  %p3117_p1 = por %p3116_p10, %p3115_p9 }
 0x2dc   : > { %p3118_p12 = pnand %p3117_p1, %p3111_p5 }
 0x2dd   : > { %2752 = vrot.lane.b32.xlu0 %v2659_v38, %s3191_s29 }
 0x2de   : > { %2780 = vrot.lane.b32.xlu1 %v2727_v52, %s3191_s29 }
 0x2e1   : > { %2756 = vrot.lane.b32.xlu0 %v2669_v39, %s3193_s17 }
 0x2e2   : > { %2784 = vrot.lane.b32.xlu1 %v2737_v58, %s3193_s17 }
 0x2e5   : > { %2760 = vrot.lane.b32.xlu0 %v2666_v37, %s3194_s9 }
 0x2e6   : > { %2788 = vrot.lane.b32.xlu1 %v2734_v26, %s3194_s9 }
 0x2e9   : > { %2764 = vrot.lane.b32.xlu0 %v2670_v23, %s3195_s19 }
 0x2ea   : > { %2792 = vrot.lane.b32.xlu1 %v2738_v11, %s3195_s19 }
 0x343   : > { %v2741_v49 = vpop.permute.xlu0 %2740 }
 0x344   : > { %v2769_v4 = vpop.permute.xlu1 %2768  ;;  %v2795_v8 = vsel %vm521_vm5, %v2643_v48, %v2741_v49 }
 0x345   : > { %v2802_v32 = vsel %vm521_vm5, %v2711_v18, %v2769_v4 }
 0x347   : > { %v2745_v55 = vpop.permute.xlu0 %2744 }
 0x348   : > { %v2773_v59 = vpop.permute.xlu1 %2772  ;;  %v2796_v30 = vsel %vm523_vm6, %v2795_v8, %v2745_v55 }
 0x349   : > { %v2803_v29 = vsel %vm523_vm6, %v2802_v32, %v2773_v59 }
 0x34b   : > { %v2749_v51 = vpop.permute.xlu0 %2748 }
 0x34c   : > { %v2777_v2 = vpop.permute.xlu1 %2776  ;;  %v2797_v21 = vsel %vm525_vm7, %v2796_v30, %v2749_v51 }
 0x34d   : > { %v2804_v44 = vsel %vm525_vm7, %v2803_v29, %v2777_v2 }
 0x34f   : > { %v2753_v27 = vpop.permute.xlu0 %2752 }
 0x350   : > { %v2781_v22 = vpop.permute.xlu1 %2780  ;;  %v2798_v46 = vsel %vm527_vm8, %v2797_v21, %v2753_v27 }
 0x351   : > { %v2805_v40 = vsel %vm527_vm8, %v2804_v44, %v2781_v22 }
 0x353   : > { %v2757_v60 = vpop.permute.xlu0 %2756 }
 0x354   : > { %v2785_v15 = vpop.permute.xlu1 %2784  ;;  %v2799_v28 = vsel %vm529_vm9, %v2798_v46, %v2757_v60 }
 0x355   : > { %v2806_v17 = vsel %vm529_vm9, %v2805_v40, %v2785_v15 }
 0x357   : > { %v2761_v31 = vpop.permute.xlu0 %2760 }
 0x358   : > { %v2789_v63 = vpop.permute.xlu1 %2788  ;;  %v2800_v9 = vsel %vm531_vm10, %v2799_v28, %v2761_v31 }
 0x359   : > { %v2807_v45 = vsel %vm531_vm10, %v2806_v17, %v2789_v63 }
 0x35b   : > { %v2765_v56 = vpop.permute.xlu0 %2764 }
 0x35c   : > { %v2793_v43 = vpop.permute.xlu1 %2792  ;;  %v2801_v7 = vsel %vm533_vm12, %v2800_v9, %v2765_v56 }
 0x35d   : > { %v2808_v54 = vsel %vm533_vm12, %v2807_v45, %v2793_v43 }
 0x396   : > { %v2514_v24 = vpop.f32.mrf.mxu0 }
 0x397   : > { %v2519_v35 = vmax.f32 %v2514_v24, 0.0 }
 0x398   : > { %v2516_v5 = vpop.f32.mrf.mxu0 }
 0x399   : > { %v2520_v57 = vmax.f32 %v2516_v5, 0.0 }
 0x39b   : > { %2936 = vmatprep.subr.msk.mxu1 %vm2428_vm11, %v2520_v57 }
 0x39c   : > { %2937 = vmatpush1.msk.msra.mxu1 %vm2428_vm11, %v2519_v35 }
 0x39d   : > { %2938 = vmatmul.mubr.msk.f32.vlgmr.msra.gmra.mxu1 %vm2522_vm14, %v2521_v36 }
 0x45d   : > { %v2598_v3 = vpop.f32.mrf.mxu1 }
 0x45e   : > { %v2809_v20 = vadd.f32 %v2801_v7, %v2598_v3 }
 0x45f   : > { %v2600_v25 = vpop.f32.mrf.mxu1 }
 0x460   : > { %v2810_v19 = vadd.f32 %v2808_v54, %v2600_v25 }
 0x462   : > { %v2813_v62 = vcombine.low %v2809_v20, %v2810_v19 }
 0x464   : > { %2815 = vst [vmem:[%s213_s27] sm:$0xff] %v2813_v62 }
 0x465   : > { %3121 = shalt.err (!%p3118_p12)
}
 0x466   : > { %s3122_s6 = scalar_lea.hbm %s2829_s10, 128  ;;  %s3126_s11 = scalar_lea.hbm %s5122_s3, 256 }
 0x467   : > { %p3123_p6 = scmp.ne.s32.totalorder %s2829_s10, %s3122_s6  ;;  %p3127_p13 = scmp.lt.s32.totalorder %s2829_s10, %s5122_s3 }
 0x468   : > { %p3128_p3 = scmp.lt.s32.totalorder %s3126_s11, %s3122_s6 }
 0x469   : > { %p3124_p7 = pnand %p3123_p6, %p5371_p0 }
 0x46a   : > { %p3129_p8 = por %p3128_p3, %p3127_p13 }
 0x46b   : > { %p3125_p11 = pneg %p3124_p7 }
 0x46d   : > { %p3130_p2 = pnand %p3129_p8, %p3125_p11 }
 0x46f   : > { %3133 = shalt.err (!%p3130_p2)
}
 0x470   : > { %2956 = dma.vmem_to_hbm [thread:$0]  (%p5371_p0), %s2832_s4, 128, %s2829_s10, %s2817_s23  }
 0x471 PF: > { %s2843_s19 = sand.u32 1, %s3164_s12   ;;  %p5372_p4 = scmp.ne.s32.totalorder %s5198_s25, 0 }
 0x472   : > { %p5373_p5 = scmp.ge.s32.totalorder %s3176_s15, 2  ;;  %s2844_s20 = scalar_lea.sflag [#allocation4], %s2843_s19 }
 0x474   : > { %p2970_p9 = pnand %p5373_p5, %p5372_p4 }
 0x476   : > { %p2971_p10 = pneg %p2970_p9 }
 0x478   : > { %3159 = dma.done.wait (%p2971_p10), %s2844_s20, 128  }
 0x479   : > { %3161 = vsyncadd (%p2971_p10), %s2844_s20, 4294967168  ;;  %p17_p1 = scmp.ge.s32.totalorder %s3242_s18, 4   ;;  %s5374_s12 = smov %s3168_s13 }
 0x47a   : > { %s5375_s13 = smov %s3172_s14  ;;  %s5376_s14 = smov %s3254_s21 }
 0x47b   : > { %s5377_s15 = smov %s3242_s18  ;;  %19 = sbr.rel (!%p17_p1) target bundleno = 6 (0x6), region = 85 }
 0x480   :  { %2849 = vsyncpa [#allocation3], 1 }
 0x481   :  { %2851 = vsyncpa [#allocation3 + $0x1], 1 }
 0x482   :  { %2852 = vsyncpa [#allocation6], 1 }
 0x483   :  { %2853 = vsyncpa [#allocation4], 1 }
 0x484   :  { %2855 = vsyncpa [#allocation4 + $0x1], 1 }

</bundles_post_ra>
